<compile_context>
chip_gen: v6e
topology: v6e:2x2x1
jax: 0.10.0
libtpu: 0.0.40
codegen_flags: <defaults>
</compile_context>

<pallas_src>
import functools

import jax
import jax.numpy as jnp
from jax import lax
from jax.experimental import pallas as pl
from jax.experimental.pallas import tpu as pltpu

_PACK = 4                                      # timesteps packed per (B, 4H) output slab
_MXU_PRECISION = jax.lax.Precision.HIGHEST     # tiny latency-bound matmuls -> exact f32


def _lstm_kernel(x_ref, wih_ref, bias_ref, h0_ref, c0_ref, whh_ref,
                 out_ref, hn_ref, cn_ref,
                 gx_scr, h_scr, c_scr,
                 *, seq_len, padded_len, outer_unroll):
    """Per-chunk LSTM body.

    x_ref   : (T_chunk*B, E) f32  chunk of time-major inputs, rows ordered (t, b)
    wih_ref : (E, 4H)        f32  W_ih^T (g-gate columns pre-scaled by 2), resident
    bias_ref: (1, 4H)        f32  b_ih + b_hh (g columns pre-scaled by 2), resident
    h0/c0   : (B, H)         f32  initial state (consumed on chunk 0 only)
    whh_ref : (H, 4H)        f32  W_hh^T (g-gate columns pre-scaled by 2), resident
    out_ref : (T_chunk//4, B, 4H) lane-dense packed hidden states for this chunk
    hn/cn   : (B, H)         final state (resident output, written each chunk)
    gx_scr  : (T_chunk*B, 4H) VMEM scratch holding the chunk's x @ W_ih^T + b
    h_scr/c_scr : (B, H)     VMEM state carried across grid steps (chunks)
    """
    chunk = pl.program_id(0)
    B, H = h0_ref.shape
    n_groups = out_ref.shape[0]
    T_chunk = n_groups * _PACK
    needs_mask = seq_len != padded_len          # Python bool: padded timesteps exist?

    @pl.when(chunk == 0)
    def _():
        h_scr[...] = h0_ref[...]
        c_scr[...] = c0_ref[...]

    # Bulk, time-parallel input projection for this chunk: one MXU matmul, off the
    # serial recurrence, parked in VMEM scratch instead of vregs.
    gx_scr[...] = (
        jnp.dot(x_ref[...], wih_ref[...],
                preferred_element_type=jnp.float32, precision=_MXU_PRECISION)
        + bias_ref[...])

    whh = whh_ref[...]                          # hoist recurrent weights out of the loop

    # Full-width tanh fix-up constants (hoisted): gates layout is [i | f | g | o] along
    # the 4H lanes; with g columns pre-scaled by 2, tanh(a_g) = 2*sigmoid(2*a_g) - 1, so
    # one sigmoid over the whole (B,4H) vreg plus s*gate_mul + gate_add covers all gates.
    lane = lax.broadcasted_iota(jnp.int32, (B, 4 * H), 1)
    is_g = (lane >= 2 * H) & (lane < 3 * H)
    gate_mul = jnp.where(is_g, 2.0, 1.0).astype(jnp.float32)
    gate_add = jnp.where(is_g, -1.0, 0.0).astype(jnp.float32)

    group_rows = _PACK * B

    def group_body(tq, carry):
        h, c = carry
        base = pl.multiple_of(tq * group_rows, group_rows)
        packed = []
        for k in range(_PACK):                  # static 4-step unroll inside the loop
            row = pl.multiple_of(base + k * B, B)
            gx = gx_scr[pl.ds(row, B), :]       # (B, 4H) precomputed input gates
            # Only this small (B,H)@(H,4H) matmul sits on the serial h->h chain.
            # TODO(synk): pltpu.matmul_push_rhs/acc_lhs/pop could pin W_hh in the MXU
            # across all timesteps; skipped here (lowering risk at sub-tile shapes).
            gates = gx + jnp.dot(h, whh, preferred_element_type=jnp.float32,
                                 precision=_MXU_PRECISION)
            s = jax.nn.sigmoid(gates)           # single EUP pass over all four gates
            u = s * gate_mul + gate_add         # full-(B,4H)-vreg tanh(g) correction
            i_g = u[:, 0 * H:1 * H]
            f_g = u[:, 1 * H:2 * H]
            g_t = u[:, 2 * H:3 * H]
            o_g = u[:, 3 * H:4 * H]
            c_new = f_g * c + i_g * g_t
            h_new = o_g * jnp.tanh(c_new)
            if needs_mask:                      # only traced when T was padded
                valid = (chunk * T_chunk + tq * _PACK + k) < seq_len
                h_new = jnp.where(valid, h_new, h)
                c_new = jnp.where(valid, c_new, c)
            h, c = h_new, c_new
            packed.append(h)
        # Lane-dense store: 4 timesteps -> one full 128-lane (B, 4H) slab.
        out_ref[tq] = jnp.concatenate(packed, axis=-1)
        return (h, c)

    h_fin, c_fin = lax.fori_loop(0, n_groups, group_body,
                                 (h_scr[...], c_scr[...]), unroll=outer_unroll)
    h_scr[...] = h_fin
    c_scr[...] = c_fin
    hn_ref[...] = h_fin
    cn_ref[...] = c_fin


def lstm_pallas(x_tbe, h0, c0, w_ih, w_hh, b_ih, b_hh, *, t_chunk_max=32):
    """x_tbe: (T, B, E) time-major embedded inputs; h0, c0: (B, H).
    Weights follow PyTorch shapes: w_ih (4H, E), w_hh (4H, H), biases (4H,)."""
    T, B, E = x_tbe.shape
    H = h0.shape[-1]
    G = 4 * H

    B_pad = max(8, ((B + 7) // 8) * 8)                          # sublane-multiple batch
    T_chunk = min(t_chunk_max, ((T + _PACK - 1) // _PACK) * _PACK)
    T_pad = ((T + T_chunk - 1) // T_chunk) * T_chunk
    n_chunks = T_pad // T_chunk
    n_groups = T_chunk // _PACK
    outer_unroll = True if n_groups <= 2 else 2                 # cap unroll for long chunks

    # Pre-scale the g-gate columns by 2 so tanh(a_g) = 2*sigmoid(2*a_g) - 1 lets one
    # sigmoid cover all four gates inside the kernel. Everything stays f32.
    col_scale = jnp.concatenate([jnp.ones((2 * H,), jnp.float32),
                                 jnp.full((H,), 2.0, jnp.float32),
                                 jnp.ones((H,), jnp.float32)])
    wih_t = jnp.transpose(w_ih).astype(jnp.float32) * col_scale[None, :]   # (E, 4H)
    whh_t = jnp.transpose(w_hh).astype(jnp.float32) * col_scale[None, :]   # (H, 4H)
    bias = ((b_ih + b_hh).astype(jnp.float32) * col_scale)[None, :]        # (1, 4H)

    # Zero-pad batch to a sublane multiple and time to a chunk multiple; padded
    # timesteps are masked in the kernel, padded rows are sliced away at the end.
    x = x_tbe.astype(jnp.float32)
    if B_pad != B:
        x = jnp.pad(x, ((0, 0), (0, B_pad - B), (0, 0)))
        h0 = jnp.pad(h0, ((0, B_pad - B), (0, 0)))
        c0 = jnp.pad(c0, ((0, B_pad - B), (0, 0)))
    if T_pad != T:
        x = jnp.pad(x, ((0, T_pad - T), (0, 0), (0, 0)))
    x2d = x.reshape(T_pad * B_pad, E)           # rows ordered (t, b) -> clean 2-D blocks

    kernel = functools.partial(_lstm_kernel, seq_len=T, padded_len=T_pad,
                               outer_unroll=outer_unroll)

    grid_spec = pltpu.PrefetchScalarGridSpec(
        num_scalar_prefetch=0,
        grid=(n_chunks,),                        # recurrence over chunks is sequential
        in_specs=[
            pl.BlockSpec((T_chunk * B_pad, E), lambda i: (i, 0)),   # x chunk (streamed)
            pl.BlockSpec((E, G), lambda i: (0, 0)),                 # W_ih^T  (resident)
            pl.BlockSpec((1, G), lambda i: (0, 0)),                 # bias    (resident)
            pl.BlockSpec((B_pad, H), lambda i: (0, 0)),             # h0
            pl.BlockSpec((B_pad, H), lambda i: (0, 0)),             # c0
            pl.BlockSpec((H, G), lambda i: (0, 0)),                 # W_hh^T  (resident)
        ],
        out_specs=[
            pl.BlockSpec((n_groups, B_pad, G), lambda i: (i, 0, 0)),  # packed outputs
            pl.BlockSpec((B_pad, H), lambda i: (0, 0)),               # h_n (resident)
            pl.BlockSpec((B_pad, H), lambda i: (0, 0)),               # c_n (resident)
        ],
        scratch_shapes=[
            pltpu.VMEM((T_chunk * B_pad, G), jnp.float32),   # per-chunk x@W_ih^T + b
            pltpu.VMEM((B_pad, H), jnp.float32),             # h carried across chunks
            pltpu.VMEM((B_pad, H), jnp.float32),             # c carried across chunks
        ],
    )

    # Explicit VMEM budget derived from the chunk sizes (double-buffered streams +
    # resident blocks + scratch) with 2x headroom; stays well inside v7x's 64 MiB.
    f32 = 4
    stream = 2 * (T_chunk * B_pad * E + n_groups * B_pad * G) * f32
    resident = (E * G + G + H * G + 4 * B_pad * H) * f32
    scratch = (T_chunk * B_pad * G + 2 * B_pad * H) * f32
    vmem_limit = min(100 * 1024 * 1024,
                     max(8 * 1024 * 1024, 2 * (stream + resident + scratch)))

    out_packed, h_n, c_n = pl.pallas_call(
        kernel,
        grid_spec=grid_spec,
        out_shape=(
            jax.ShapeDtypeStruct((T_pad // _PACK, B_pad, G), jnp.float32),
            jax.ShapeDtypeStruct((B_pad, H), jnp.float32),
            jax.ShapeDtypeStruct((B_pad, H), jnp.float32),
        ),
        compiler_params=pltpu.CompilerParams(
            # The single chunk axis is inherently sequential. If batch grows, add a
            # leading "parallel" batch-tile axis so v7x's 2 TensorCores split the
            # independent per-row recurrences.
            dimension_semantics=("arbitrary",),
            vmem_limit_bytes=int(vmem_limit)),
    )(x2d, wih_t, bias, h0, c0, whh_t)

    # Un-interleave the lane-packed output: (T_pad//4, B, 4, H) -> (T_pad, B, H).
    out_tbh = (out_packed.reshape(T_pad // _PACK, B_pad, _PACK, H)
               .transpose(0, 2, 1, 3)
               .reshape(T_pad, B_pad, H))
    return out_tbh[:T, :B], h_n[:B], c_n[:B]


def decoder_forward(params, decoder_input, hidden):
    """decoder_input: (B, T) int32 token ids; hidden = (h0, c0) each (1, B, H).
    Returns (decoder_output (B, T, H), (h_n (1,B,H), c_n (1,B,H)))."""
    emb_table = params["embedding"]
    h0, c0 = hidden
    # Embedding lookup (data-dependent gather) stays as JAX glue; gather directly in
    # time-major order so no separate transpose op is emitted.
    x_tbe = jnp.take(emb_table, decoder_input.T, axis=0)          # (T, B, E)

    out_tbh, h_n, c_n = lstm_pallas(
        x_tbe, h0[0].astype(jnp.float32), c0[0].astype(jnp.float32),
        params["w_ih"], params["w_hh"], params["b_ih"], params["b_hh"])

    decoder_output = jnp.transpose(out_tbh, (1, 0, 2))            # (B, T, H)
    return decoder_output, (h_n[None, ...], c_n[None, ...])


def _reference_forward(params, decoder_input, hidden):
    """Pure-JAX f32 reference (same math as torch.nn.LSTM, gate order i,f,g,o)."""
    emb = jnp.take(params["embedding"], decoder_input, axis=0)    # (B, T, E)
    h0, c0 = hidden
    w_ih, w_hh = params["w_ih"], params["w_hh"]
    b = params["b_ih"] + params["b_hh"]
    H = h0.shape[-1]
    hp = jax.lax.Precision.HIGHEST

    def step(carry, x_t):
        h, c = carry
        gates = (jnp.dot(x_t, w_ih.T, precision=hp)
                 + jnp.dot(h, w_hh.T, precision=hp) + b)
        i = jax.nn.sigmoid(gates[:, 0 * H:1 * H])
        f = jax.nn.sigmoid(gates[:, 1 * H:2 * H])
        g = jnp.tanh(gates[:, 2 * H:3 * H])
        o = jax.nn.sigmoid(gates[:, 3 * H:4 * H])
        c_new = f * c + i * g
        h_new = o * jnp.tanh(c_new)
        return (h_new, c_new), h_new

    x_tbe = jnp.transpose(emb, (1, 0, 2))
    (h_n, c_n), out_tbh = jax.lax.scan(step, (h0[0], c0[0]), x_tbe)
    return jnp.transpose(out_tbh, (1, 0, 2)), (h_n[None], c_n[None])


if __name__ == "__main__":
    # Small shapes consistent with the module's forward.
    corpus_len = 50
    E = 32      # decoder_embedding_num
    H = 32      # decoder_hidden_num
    B = 2       # batch
    T = 8       # sequence length

    key = jax.random.PRNGKey(0)
    k_emb, k_wih, k_whh, k_bih, k_bhh, k_tok, k_h, k_c = jax.random.split(key, 8)

    scale = 1.0 / jnp.sqrt(H)
    params = {
        "embedding": jax.random.normal(k_emb, (corpus_len, E), jnp.float32),
        "w_ih": jax.random.uniform(k_wih, (4 * H, E), jnp.float32, -scale, scale),
        "w_hh": jax.random.uniform(k_whh, (4 * H, H), jnp.float32, -scale, scale),
        "b_ih": jax.random.uniform(k_bih, (4 * H,), jnp.float32, -scale, scale),
        "b_hh": jax.random.uniform(k_bhh, (4 * H,), jnp.float32, -scale, scale),
    }

    decoder_input = jax.random.randint(k_tok, (B, T), 0, corpus_len, jnp.int32)
    h0 = jax.random.normal(k_h, (1, B, H), jnp.float32)
    c0 = jax.random.normal(k_c, (1, B, H), jnp.float32)

    out, (h_n, c_n) = decoder_forward(params, decoder_input, (h0, c0))
    jax.block_until_ready((out, h_n, c_n))

    # Validate against a pure-JAX f32 reference. With the bf16 recurrence removed the
    # kernel is f32-tight; 1e-3 leaves margin only for the tanh-via-sigmoid identity
    # and MXU accumulation-order differences.
    ref_out, (ref_h, ref_c) = _reference_forward(params, decoder_input, (h0, c0))
    assert out.shape == (B, T, H) and h_n.shape == (1, B, H) and c_n.shape == (1, B, H)
    assert jnp.allclose(out, ref_out, atol=1e-3), "output mismatch"
    assert jnp.allclose(h_n, ref_h, atol=1e-3), "h_n mismatch"
    assert jnp.allclose(c_n, ref_c, atol=1e-3), "c_n mismatch"

    print("KERNEL_OK")
</pallas_src>

<mosaic_0001>
module attributes {stable_mosaic.version = 11 : i64} {
  func.func @_lstm_kernel(%arg0: i32, %arg1: memref<64x32xf32, #tpu.memory_space<vmem>>, %arg2: memref<32x128xf32, #tpu.memory_space<vmem>>, %arg3: memref<1x128xf32, #tpu.memory_space<vmem>>, %arg4: memref<8x32xf32, #tpu.memory_space<vmem>>, %arg5: memref<8x32xf32, #tpu.memory_space<vmem>>, %arg6: memref<32x128xf32, #tpu.memory_space<vmem>>, %arg7: memref<2x8x128xf32, #tpu.memory_space<vmem>>, %arg8: memref<8x32xf32, #tpu.memory_space<vmem>>, %arg9: memref<8x32xf32, #tpu.memory_space<vmem>>, %arg10: memref<64x128xf32, #tpu.memory_space<vmem>>, %arg11: memref<8x32xf32, #tpu.memory_space<vmem>>, %arg12: memref<8x32xf32, #tpu.memory_space<vmem>>) attributes {dimension_semantics = [#tpu.dimension_semantics<arbitrary>], iteration_bounds = array<i64: 1>, scalar_prefetch = 0 : i64, scratch_operands = 3 : i64, tpu.core_type = #tpu.core_type<tc>, window_params = [{transform_indices = @transform_0, window_bounds = array<i64: 64, 32>}, {pipeline_mode = #tpu.pipeline_mode<synchronous>, transform_indices = @transform_1, window_bounds = array<i64: 32, 128>}, {pipeline_mode = #tpu.pipeline_mode<synchronous>, transform_indices = @transform_2, window_bounds = array<i64: 1, 128>}, {pipeline_mode = #tpu.pipeline_mode<synchronous>, transform_indices = @transform_3, window_bounds = array<i64: 8, 32>}, {pipeline_mode = #tpu.pipeline_mode<synchronous>, transform_indices = @transform_4, window_bounds = array<i64: 8, 32>}, {pipeline_mode = #tpu.pipeline_mode<synchronous>, transform_indices = @transform_5, window_bounds = array<i64: 32, 128>}, {transform_indices = @transform_6, window_bounds = array<i64: 2, 8, 128>}, {pipeline_mode = #tpu.pipeline_mode<synchronous>, transform_indices = @transform_7, window_bounds = array<i64: 8, 32>}, {pipeline_mode = #tpu.pipeline_mode<synchronous>, transform_indices = @transform_8, window_bounds = array<i64: 8, 32>}]} {
    %c0_i32 = arith.constant 0 : i32
    %0 = arith.cmpi eq, %arg0, %c0_i32 : i32
    %1 = arith.extui %0 : i1 to i32
    %c0_i32_0 = arith.constant 0 : i32
    %2 = arith.cmpi ne, %1, %c0_i32_0 : i32
    scf.if %2 {
      %c0_61 = arith.constant 0 : index
      %c0_62 = arith.constant 0 : index
      %219 = vector.load %arg4[%c0_61, %c0_62] : memref<8x32xf32, #tpu.memory_space<vmem>>, vector<8x32xf32>
      %c0_63 = arith.constant 0 : index
      %c0_64 = arith.constant 0 : index
      %220 = vector.load %arg11[%c0_63, %c0_64] : memref<8x32xf32, #tpu.memory_space<vmem>>, vector<8x32xf32>
      tpu.vector_store %arg11[%c0_63, %c0_64], %219 {strides = array<i32>} : memref<8x32xf32, #tpu.memory_space<vmem>>, vector<8x32xf32>,
      %c0_65 = arith.constant 0 : index
      %c0_66 = arith.constant 0 : index
      %221 = vector.load %arg5[%c0_65, %c0_66] : memref<8x32xf32, #tpu.memory_space<vmem>>, vector<8x32xf32>
      %c0_67 = arith.constant 0 : index
      %c0_68 = arith.constant 0 : index
      %222 = vector.load %arg12[%c0_67, %c0_68] : memref<8x32xf32, #tpu.memory_space<vmem>>, vector<8x32xf32>
      tpu.vector_store %arg12[%c0_67, %c0_68], %221 {strides = array<i32>} : memref<8x32xf32, #tpu.memory_space<vmem>>, vector<8x32xf32>,
    } else {
    }
    %c0 = arith.constant 0 : index
    %c0_1 = arith.constant 0 : index
    %3 = vector.load %arg1[%c0, %c0_1] : memref<64x32xf32, #tpu.memory_space<vmem>>, vector<64x32xf32>
    %c0_2 = arith.constant 0 : index
    %c0_3 = arith.constant 0 : index
    %4 = vector.load %arg2[%c0_2, %c0_3] : memref<32x128xf32, #tpu.memory_space<vmem>>, vector<32x128xf32>
    %cst = arith.constant dense<0.000000e+00> : vector<64x128xf32>
    %5 = tpu.matmul %3, %4, %cst {dimension_numbers = #tpu.dot_dimension_numbers<[1], [0], [0], [1], [0, 0, 1, 1], [], []>, precision = #tpu.contract_precision<fp32>} : vector<64x32xf32>, vector<32x128xf32>, vector<64x128xf32> -> vector<64x128xf32>
    %c0_4 = arith.constant 0 : index
    %c0_5 = arith.constant 0 : index
    %6 = vector.load %arg3[%c0_4, %c0_5] : memref<1x128xf32, #tpu.memory_space<vmem>>, vector<1x128xf32>
    %7 = vector.broadcast %6 : vector<1x128xf32> to vector<64x128xf32>
    %8 = arith.addf %5, %7 : vector<64x128xf32>
    %c0_6 = arith.constant 0 : index
    %c0_7 = arith.constant 0 : index
    %9 = vector.load %arg10[%c0_6, %c0_7] : memref<64x128xf32, #tpu.memory_space<vmem>>, vector<64x128xf32>
    tpu.vector_store %arg10[%c0_6, %c0_7], %8 {strides = array<i32>} : memref<64x128xf32, #tpu.memory_space<vmem>>, vector<64x128xf32>,
    %c0_8 = arith.constant 0 : index
    %c0_9 = arith.constant 0 : index
    %10 = vector.load %arg6[%c0_8, %c0_9] : memref<32x128xf32, #tpu.memory_space<vmem>>, vector<32x128xf32>
    %11 = tpu.iota {dimensions = array<i32: 1>} : vector<8x128xi32>
    %c64_i32 = arith.constant 64 : i32
    %12 = vector.broadcast %c64_i32 : i32 to vector<8x128xi32>
    %13 = arith.cmpi sge, %11, %12 : vector<8x128xi32>
    %c96_i32 = arith.constant 96 : i32
    %14 = vector.broadcast %c96_i32 : i32 to vector<8x128xi32>
    %15 = arith.cmpi slt, %11, %14 : vector<8x128xi32>
    %16 = arith.andi %13, %15 : vector<8x128xi1>
    %cst_10 = arith.constant 2.000000e+00 : f32
    %cst_11 = arith.constant 1.000000e+00 : f32
    %17 = vector.broadcast %cst_10 : f32 to vector<8x128xf32>
    %18 = vector.broadcast %cst_11 : f32 to vector<8x128xf32>
    %19 = arith.select %16, %17, %18 : vector<8x128xi1>, vector<8x128xf32>
    %cst_12 = arith.constant -1.000000e+00 : f32
    %cst_13 = arith.constant 0.000000e+00 : f32
    %20 = vector.broadcast %cst_12 : f32 to vector<8x128xf32>
    %21 = vector.broadcast %cst_13 : f32 to vector<8x128xf32>
    %22 = arith.select %16, %20, %21 : vector<8x128xi1>, vector<8x128xf32>
    %c0_14 = arith.constant 0 : index
    %c0_15 = arith.constant 0 : index
    %23 = vector.load %arg11[%c0_14, %c0_15] : memref<8x32xf32, #tpu.memory_space<vmem>>, vector<8x32xf32>
    %c0_16 = arith.constant 0 : index
    %c0_17 = arith.constant 0 : index
    %24 = vector.load %arg12[%c0_16, %c0_17] : memref<8x32xf32, #tpu.memory_space<vmem>>, vector<8x32xf32>
    %c0_i32_18 = arith.constant 0 : i32
    %c32_i32 = arith.constant 32 : i32
    %25 = arith.muli %c0_i32_18, %c32_i32 : i32
    %26 = tpu.assume_multiple %25, 32 : i32
    %c0_i32_19 = arith.constant 0 : i32
    %27 = arith.addi %26, %c0_i32_19 : i32
    %28 = tpu.assume_multiple %27, 8 : i32
    %29 = arith.index_cast %28 : i32 to index
    %c0_20 = arith.constant 0 : index
    %30 = vector.load %arg10[%29, %c0_20] : memref<64x128xf32, #tpu.memory_space<vmem>>, vector<8x128xf32>
    %cst_21 = arith.constant dense<0.000000e+00> : vector<8x128xf32>
    %31 = tpu.matmul %23, %10, %cst_21 {dimension_numbers = #tpu.dot_dimension_numbers<[1], [0], [0], [1], [0, 0, 1, 1], [], []>, precision = #tpu.contract_precision<fp32>} : vector<8x32xf32>, vector<32x128xf32>, vector<8x128xf32> -> vector<8x128xf32>
    %32 = arith.addf %30, %31 : vector<8x128xf32>
    %33 = arith.negf %32 : vector<8x128xf32>
    %34 = math.exp %33 : vector<8x128xf32>
    %cst_22 = arith.constant 1.000000e+00 : f32
    %35 = vector.broadcast %cst_22 : f32 to vector<8x128xf32>
    %36 = arith.addf %35, %34 : vector<8x128xf32>
    %37 = arith.divf %35, %36 : vector<8x128xf32>
    %38 = arith.mulf %37, %19 : vector<8x128xf32>
    %39 = arith.addf %38, %22 : vector<8x128xf32>
    %40 = vector.extract_strided_slice %39 {offsets = [0, 0], sizes = [8, 32], strides = [1, 1]} : vector<8x128xf32> to vector<8x32xf32>
    %41 = vector.extract_strided_slice %39 {offsets = [0, 32], sizes = [8, 32], strides = [1, 1]} : vector<8x128xf32> to vector<8x32xf32>
    %42 = vector.extract_strided_slice %39 {offsets = [0, 64], sizes = [8, 32], strides = [1, 1]} : vector<8x128xf32> to vector<8x32xf32>
    %43 = vector.extract_strided_slice %39 {offsets = [0, 96], sizes = [8, 32], strides = [1, 1]} : vector<8x128xf32> to vector<8x32xf32>
    %44 = arith.mulf %41, %24 : vector<8x32xf32>
    %45 = arith.mulf %40, %42 : vector<8x32xf32>
    %46 = arith.addf %44, %45 : vector<8x32xf32>
    %47 = math.tanh %46 : vector<8x32xf32>
    %48 = arith.mulf %43, %47 : vector<8x32xf32>
    %c8_i32 = arith.constant 8 : i32
    %49 = arith.addi %26, %c8_i32 : i32
    %50 = tpu.assume_multiple %49, 8 : i32
    %51 = arith.index_cast %50 : i32 to index
    %c0_23 = arith.constant 0 : index
    %52 = vector.load %arg10[%51, %c0_23] : memref<64x128xf32, #tpu.memory_space<vmem>>, vector<8x128xf32>
    %cst_24 = arith.constant dense<0.000000e+00> : vector<8x128xf32>
    %53 = tpu.matmul %48, %10, %cst_24 {dimension_numbers = #tpu.dot_dimension_numbers<[1], [0], [0], [1], [0, 0, 1, 1], [], []>, precision = #tpu.contract_precision<fp32>} : vector<8x32xf32>, vector<32x128xf32>, vector<8x128xf32> -> vector<8x128xf32>
    %54 = arith.addf %52, %53 : vector<8x128xf32>
    %55 = arith.negf %54 : vector<8x128xf32>
    %56 = math.exp %55 : vector<8x128xf32>
    %cst_25 = arith.constant 1.000000e+00 : f32
    %57 = vector.broadcast %cst_25 : f32 to vector<8x128xf32>
    %58 = arith.addf %57, %56 : vector<8x128xf32>
    %59 = arith.divf %57, %58 : vector<8x128xf32>
    %60 = arith.mulf %59, %19 : vector<8x128xf32>
    %61 = arith.addf %60, %22 : vector<8x128xf32>
    %62 = vector.extract_strided_slice %61 {offsets = [0, 0], sizes = [8, 32], strides = [1, 1]} : vector<8x128xf32> to vector<8x32xf32>
    %63 = vector.extract_strided_slice %61 {offsets = [0, 32], sizes = [8, 32], strides = [1, 1]} : vector<8x128xf32> to vector<8x32xf32>
    %64 = vector.extract_strided_slice %61 {offsets = [0, 64], sizes = [8, 32], strides = [1, 1]} : vector<8x128xf32> to vector<8x32xf32>
    %65 = vector.extract_strided_slice %61 {offsets = [0, 96], sizes = [8, 32], strides = [1, 1]} : vector<8x128xf32> to vector<8x32xf32>
    %66 = arith.mulf %63, %46 : vector<8x32xf32>
    %67 = arith.mulf %62, %64 : vector<8x32xf32>
    %68 = arith.addf %66, %67 : vector<8x32xf32>
    %69 = math.tanh %68 : vector<8x32xf32>
    %70 = arith.mulf %65, %69 : vector<8x32xf32>
    %c16_i32 = arith.constant 16 : i32
    %71 = arith.addi %26, %c16_i32 : i32
    %72 = tpu.assume_multiple %71, 8 : i32
    %73 = arith.index_cast %72 : i32 to index
    %c0_26 = arith.constant 0 : index
    %74 = vector.load %arg10[%73, %c0_26] : memref<64x128xf32, #tpu.memory_space<vmem>>, vector<8x128xf32>
    %cst_27 = arith.constant dense<0.000000e+00> : vector<8x128xf32>
    %75 = tpu.matmul %70, %10, %cst_27 {dimension_numbers = #tpu.dot_dimension_numbers<[1], [0], [0], [1], [0, 0, 1, 1], [], []>, precision = #tpu.contract_precision<fp32>} : vector<8x32xf32>, vector<32x128xf32>, vector<8x128xf32> -> vector<8x128xf32>
    %76 = arith.addf %74, %75 : vector<8x128xf32>
    %77 = arith.negf %76 : vector<8x128xf32>
    %78 = math.exp %77 : vector<8x128xf32>
    %cst_28 = arith.constant 1.000000e+00 : f32
    %79 = vector.broadcast %cst_28 : f32 to vector<8x128xf32>
    %80 = arith.addf %79, %78 : vector<8x128xf32>
    %81 = arith.divf %79, %80 : vector<8x128xf32>
    %82 = arith.mulf %81, %19 : vector<8x128xf32>
    %83 = arith.addf %82, %22 : vector<8x128xf32>
    %84 = vector.extract_strided_slice %83 {offsets = [0, 0], sizes = [8, 32], strides = [1, 1]} : vector<8x128xf32> to vector<8x32xf32>
    %85 = vector.extract_strided_slice %83 {offsets = [0, 32], sizes = [8, 32], strides = [1, 1]} : vector<8x128xf32> to vector<8x32xf32>
    %86 = vector.extract_strided_slice %83 {offsets = [0, 64], sizes = [8, 32], strides = [1, 1]} : vector<8x128xf32> to vector<8x32xf32>
    %87 = vector.extract_strided_slice %83 {offsets = [0, 96], sizes = [8, 32], strides = [1, 1]} : vector<8x128xf32> to vector<8x32xf32>
    %88 = arith.mulf %85, %68 : vector<8x32xf32>
    %89 = arith.mulf %84, %86 : vector<8x32xf32>
    %90 = arith.addf %88, %89 : vector<8x32xf32>
    %91 = math.tanh %90 : vector<8x32xf32>
    %92 = arith.mulf %87, %91 : vector<8x32xf32>
    %c24_i32 = arith.constant 24 : i32
    %93 = arith.addi %26, %c24_i32 : i32
    %94 = tpu.assume_multiple %93, 8 : i32
    %95 = arith.index_cast %94 : i32 to index
    %c0_29 = arith.constant 0 : index
    %96 = vector.load %arg10[%95, %c0_29] : memref<64x128xf32, #tpu.memory_space<vmem>>, vector<8x128xf32>
    %cst_30 = arith.constant dense<0.000000e+00> : vector<8x128xf32>
    %97 = tpu.matmul %92, %10, %cst_30 {dimension_numbers = #tpu.dot_dimension_numbers<[1], [0], [0], [1], [0, 0, 1, 1], [], []>, precision = #tpu.contract_precision<fp32>} : vector<8x32xf32>, vector<32x128xf32>, vector<8x128xf32> -> vector<8x128xf32>
    %98 = arith.addf %96, %97 : vector<8x128xf32>
    %99 = arith.negf %98 : vector<8x128xf32>
    %100 = math.exp %99 : vector<8x128xf32>
    %cst_31 = arith.constant 1.000000e+00 : f32
    %101 = vector.broadcast %cst_31 : f32 to vector<8x128xf32>
    %102 = arith.addf %101, %100 : vector<8x128xf32>
    %103 = arith.divf %101, %102 : vector<8x128xf32>
    %104 = arith.mulf %103, %19 : vector<8x128xf32>
    %105 = arith.addf %104, %22 : vector<8x128xf32>
    %106 = vector.extract_strided_slice %105 {offsets = [0, 0], sizes = [8, 32], strides = [1, 1]} : vector<8x128xf32> to vector<8x32xf32>
    %107 = vector.extract_strided_slice %105 {offsets = [0, 32], sizes = [8, 32], strides = [1, 1]} : vector<8x128xf32> to vector<8x32xf32>
    %108 = vector.extract_strided_slice %105 {offsets = [0, 64], sizes = [8, 32], strides = [1, 1]} : vector<8x128xf32> to vector<8x32xf32>
    %109 = vector.extract_strided_slice %105 {offsets = [0, 96], sizes = [8, 32], strides = [1, 1]} : vector<8x128xf32> to vector<8x32xf32>
    %110 = arith.mulf %107, %90 : vector<8x32xf32>
    %111 = arith.mulf %106, %108 : vector<8x32xf32>
    %112 = arith.addf %110, %111 : vector<8x32xf32>
    %113 = math.tanh %112 : vector<8x32xf32>
    %114 = arith.mulf %109, %113 : vector<8x32xf32>
    %115 = tpu.concatenate %48, %70, %92, %114 in 1 : vector<8x32xf32>, vector<8x32xf32>, vector<8x32xf32>, vector<8x32xf32> -> vector<8x128xf32>
    %116 = arith.index_cast %c0_i32_18 : i32 to index
    %c0_32 = arith.constant 0 : index
    %c0_33 = arith.constant 0 : index
    %117 = vector.load %arg7[%116, %c0_32, %c0_33] : memref<2x8x128xf32, #tpu.memory_space<vmem>>, vector<1x8x128xf32>
    %118 = vector.shape_cast %117 : vector<1x8x128xf32> to vector<8x128xf32>
    %119 = vector.shape_cast %115 : vector<8x128xf32> to vector<1x8x128xf32>
    tpu.vector_store %arg7[%116, %c0_32, %c0_33], %119 {strides = array<i32>} : memref<2x8x128xf32, #tpu.memory_space<vmem>>, vector<1x8x128xf32>,
    %c1_i32 = arith.constant 1 : i32
    %c32_i32_34 = arith.constant 32 : i32
    %120 = arith.muli %c1_i32, %c32_i32_34 : i32
    %121 = tpu.assume_multiple %120, 32 : i32
    %c0_i32_35 = arith.constant 0 : i32
    %122 = arith.addi %121, %c0_i32_35 : i32
    %123 = tpu.assume_multiple %122, 8 : i32
    %124 = arith.index_cast %123 : i32 to index
    %c0_36 = arith.constant 0 : index
    %125 = vector.load %arg10[%124, %c0_36] : memref<64x128xf32, #tpu.memory_space<vmem>>, vector<8x128xf32>
    %cst_37 = arith.constant dense<0.000000e+00> : vector<8x128xf32>
    %126 = tpu.matmul %114, %10, %cst_37 {dimension_numbers = #tpu.dot_dimension_numbers<[1], [0], [0], [1], [0, 0, 1, 1], [], []>, precision = #tpu.contract_precision<fp32>} : vector<8x32xf32>, vector<32x128xf32>, vector<8x128xf32> -> vector<8x128xf32>
    %127 = arith.addf %125, %126 : vector<8x128xf32>
    %128 = arith.negf %127 : vector<8x128xf32>
    %129 = math.exp %128 : vector<8x128xf32>
    %cst_38 = arith.constant 1.000000e+00 : f32
    %130 = vector.broadcast %cst_38 : f32 to vector<8x128xf32>
    %131 = arith.addf %130, %129 : vector<8x128xf32>
    %132 = arith.divf %130, %131 : vector<8x128xf32>
    %133 = arith.mulf %132, %19 : vector<8x128xf32>
    %134 = arith.addf %133, %22 : vector<8x128xf32>
    %135 = vector.extract_strided_slice %134 {offsets = [0, 0], sizes = [8, 32], strides = [1, 1]} : vector<8x128xf32> to vector<8x32xf32>
    %136 = vector.extract_strided_slice %134 {offsets = [0, 32], sizes = [8, 32], strides = [1, 1]} : vector<8x128xf32> to vector<8x32xf32>
    %137 = vector.extract_strided_slice %134 {offsets = [0, 64], sizes = [8, 32], strides = [1, 1]} : vector<8x128xf32> to vector<8x32xf32>
    %138 = vector.extract_strided_slice %134 {offsets = [0, 96], sizes = [8, 32], strides = [1, 1]} : vector<8x128xf32> to vector<8x32xf32>
    %139 = arith.mulf %136, %112 : vector<8x32xf32>
    %140 = arith.mulf %135, %137 : vector<8x32xf32>
    %141 = arith.addf %139, %140 : vector<8x32xf32>
    %142 = math.tanh %141 : vector<8x32xf32>
    %143 = arith.mulf %138, %142 : vector<8x32xf32>
    %c8_i32_39 = arith.constant 8 : i32
    %144 = arith.addi %121, %c8_i32_39 : i32
    %145 = tpu.assume_multiple %144, 8 : i32
    %146 = arith.index_cast %145 : i32 to index
    %c0_40 = arith.constant 0 : index
    %147 = vector.load %arg10[%146, %c0_40] : memref<64x128xf32, #tpu.memory_space<vmem>>, vector<8x128xf32>
    %cst_41 = arith.constant dense<0.000000e+00> : vector<8x128xf32>
    %148 = tpu.matmul %143, %10, %cst_41 {dimension_numbers = #tpu.dot_dimension_numbers<[1], [0], [0], [1], [0, 0, 1, 1], [], []>, precision = #tpu.contract_precision<fp32>} : vector<8x32xf32>, vector<32x128xf32>, vector<8x128xf32> -> vector<8x128xf32>
    %149 = arith.addf %147, %148 : vector<8x128xf32>
    %150 = arith.negf %149 : vector<8x128xf32>
    %151 = math.exp %150 : vector<8x128xf32>
    %cst_42 = arith.constant 1.000000e+00 : f32
    %152 = vector.broadcast %cst_42 : f32 to vector<8x128xf32>
    %153 = arith.addf %152, %151 : vector<8x128xf32>
    %154 = arith.divf %152, %153 : vector<8x128xf32>
    %155 = arith.mulf %154, %19 : vector<8x128xf32>
    %156 = arith.addf %155, %22 : vector<8x128xf32>
    %157 = vector.extract_strided_slice %156 {offsets = [0, 0], sizes = [8, 32], strides = [1, 1]} : vector<8x128xf32> to vector<8x32xf32>
    %158 = vector.extract_strided_slice %156 {offsets = [0, 32], sizes = [8, 32], strides = [1, 1]} : vector<8x128xf32> to vector<8x32xf32>
    %159 = vector.extract_strided_slice %156 {offsets = [0, 64], sizes = [8, 32], strides = [1, 1]} : vector<8x128xf32> to vector<8x32xf32>
    %160 = vector.extract_strided_slice %156 {offsets = [0, 96], sizes = [8, 32], strides = [1, 1]} : vector<8x128xf32> to vector<8x32xf32>
    %161 = arith.mulf %158, %141 : vector<8x32xf32>
    %162 = arith.mulf %157, %159 : vector<8x32xf32>
    %163 = arith.addf %161, %162 : vector<8x32xf32>
    %164 = math.tanh %163 : vector<8x32xf32>
    %165 = arith.mulf %160, %164 : vector<8x32xf32>
    %c16_i32_43 = arith.constant 16 : i32
    %166 = arith.addi %121, %c16_i32_43 : i32
    %167 = tpu.assume_multiple %166, 8 : i32
    %168 = arith.index_cast %167 : i32 to index
    %c0_44 = arith.constant 0 : index
    %169 = vector.load %arg10[%168, %c0_44] : memref<64x128xf32, #tpu.memory_space<vmem>>, vector<8x128xf32>
    %cst_45 = arith.constant dense<0.000000e+00> : vector<8x128xf32>
    %170 = tpu.matmul %165, %10, %cst_45 {dimension_numbers = #tpu.dot_dimension_numbers<[1], [0], [0], [1], [0, 0, 1, 1], [], []>, precision = #tpu.contract_precision<fp32>} : vector<8x32xf32>, vector<32x128xf32>, vector<8x128xf32> -> vector<8x128xf32>
    %171 = arith.addf %169, %170 : vector<8x128xf32>
    %172 = arith.negf %171 : vector<8x128xf32>
    %173 = math.exp %172 : vector<8x128xf32>
    %cst_46 = arith.constant 1.000000e+00 : f32
    %174 = vector.broadcast %cst_46 : f32 to vector<8x128xf32>
    %175 = arith.addf %174, %173 : vector<8x128xf32>
    %176 = arith.divf %174, %175 : vector<8x128xf32>
    %177 = arith.mulf %176, %19 : vector<8x128xf32>
    %178 = arith.addf %177, %22 : vector<8x128xf32>
    %179 = vector.extract_strided_slice %178 {offsets = [0, 0], sizes = [8, 32], strides = [1, 1]} : vector<8x128xf32> to vector<8x32xf32>
    %180 = vector.extract_strided_slice %178 {offsets = [0, 32], sizes = [8, 32], strides = [1, 1]} : vector<8x128xf32> to vector<8x32xf32>
    %181 = vector.extract_strided_slice %178 {offsets = [0, 64], sizes = [8, 32], strides = [1, 1]} : vector<8x128xf32> to vector<8x32xf32>
    %182 = vector.extract_strided_slice %178 {offsets = [0, 96], sizes = [8, 32], strides = [1, 1]} : vector<8x128xf32> to vector<8x32xf32>
    %183 = arith.mulf %180, %163 : vector<8x32xf32>
    %184 = arith.mulf %179, %181 : vector<8x32xf32>
    %185 = arith.addf %183, %184 : vector<8x32xf32>
    %186 = math.tanh %185 : vector<8x32xf32>
    %187 = arith.mulf %182, %186 : vector<8x32xf32>
    %c24_i32_47 = arith.constant 24 : i32
    %188 = arith.addi %121, %c24_i32_47 : i32
    %189 = tpu.assume_multiple %188, 8 : i32
    %190 = arith.index_cast %189 : i32 to index
    %c0_48 = arith.constant 0 : index
    %191 = vector.load %arg10[%190, %c0_48] : memref<64x128xf32, #tpu.memory_space<vmem>>, vector<8x128xf32>
    %cst_49 = arith.constant dense<0.000000e+00> : vector<8x128xf32>
    %192 = tpu.matmul %187, %10, %cst_49 {dimension_numbers = #tpu.dot_dimension_numbers<[1], [0], [0], [1], [0, 0, 1, 1], [], []>, precision = #tpu.contract_precision<fp32>} : vector<8x32xf32>, vector<32x128xf32>, vector<8x128xf32> -> vector<8x128xf32>
    %193 = arith.addf %191, %192 : vector<8x128xf32>
    %194 = arith.negf %193 : vector<8x128xf32>
    %195 = math.exp %194 : vector<8x128xf32>
    %cst_50 = arith.constant 1.000000e+00 : f32
    %196 = vector.broadcast %cst_50 : f32 to vector<8x128xf32>
    %197 = arith.addf %196, %195 : vector<8x128xf32>
    %198 = arith.divf %196, %197 : vector<8x128xf32>
    %199 = arith.mulf %198, %19 : vector<8x128xf32>
    %200 = arith.addf %199, %22 : vector<8x128xf32>
    %201 = vector.extract_strided_slice %200 {offsets = [0, 0], sizes = [8, 32], strides = [1, 1]} : vector<8x128xf32> to vector<8x32xf32>
    %202 = vector.extract_strided_slice %200 {offsets = [0, 32], sizes = [8, 32], strides = [1, 1]} : vector<8x128xf32> to vector<8x32xf32>
    %203 = vector.extract_strided_slice %200 {offsets = [0, 64], sizes = [8, 32], strides = [1, 1]} : vector<8x128xf32> to vector<8x32xf32>
    %204 = vector.extract_strided_slice %200 {offsets = [0, 96], sizes = [8, 32], strides = [1, 1]} : vector<8x128xf32> to vector<8x32xf32>
    %205 = arith.mulf %202, %185 : vector<8x32xf32>
    %206 = arith.mulf %201, %203 : vector<8x32xf32>
    %207 = arith.addf %205, %206 : vector<8x32xf32>
    %208 = math.tanh %207 : vector<8x32xf32>
    %209 = arith.mulf %204, %208 : vector<8x32xf32>
    %210 = tpu.concatenate %143, %165, %187, %209 in 1 : vector<8x32xf32>, vector<8x32xf32>, vector<8x32xf32>, vector<8x32xf32> -> vector<8x128xf32>
    %211 = arith.index_cast %c1_i32 : i32 to index
    %c0_51 = arith.constant 0 : index
    %c0_52 = arith.constant 0 : index
    %212 = vector.load %arg7[%211, %c0_51, %c0_52] : memref<2x8x128xf32, #tpu.memory_space<vmem>>, vector<1x8x128xf32>
    %213 = vector.shape_cast %212 : vector<1x8x128xf32> to vector<8x128xf32>
    %214 = vector.shape_cast %210 : vector<8x128xf32> to vector<1x8x128xf32>
    tpu.vector_store %arg7[%211, %c0_51, %c0_52], %214 {strides = array<i32>} : memref<2x8x128xf32, #tpu.memory_space<vmem>>, vector<1x8x128xf32>,
    %c2_i32 = arith.constant 2 : i32
    %c0_53 = arith.constant 0 : index
    %c0_54 = arith.constant 0 : index
    %215 = vector.load %arg11[%c0_53, %c0_54] : memref<8x32xf32, #tpu.memory_space<vmem>>, vector<8x32xf32>
    tpu.vector_store %arg11[%c0_53, %c0_54], %209 {strides = array<i32>} : memref<8x32xf32, #tpu.memory_space<vmem>>, vector<8x32xf32>,
    %c0_55 = arith.constant 0 : index
    %c0_56 = arith.constant 0 : index
    %216 = vector.load %arg12[%c0_55, %c0_56] : memref<8x32xf32, #tpu.memory_space<vmem>>, vector<8x32xf32>
    tpu.vector_store %arg12[%c0_55, %c0_56], %207 {strides = array<i32>} : memref<8x32xf32, #tpu.memory_space<vmem>>, vector<8x32xf32>,
    %c0_57 = arith.constant 0 : index
    %c0_58 = arith.constant 0 : index
    %217 = vector.load %arg8[%c0_57, %c0_58] : memref<8x32xf32, #tpu.memory_space<vmem>>, vector<8x32xf32>
    tpu.vector_store %arg8[%c0_57, %c0_58], %209 {strides = array<i32>} : memref<8x32xf32, #tpu.memory_space<vmem>>, vector<8x32xf32>,
    %c0_59 = arith.constant 0 : index
    %c0_60 = arith.constant 0 : index
    %218 = vector.load %arg9[%c0_59, %c0_60] : memref<8x32xf32, #tpu.memory_space<vmem>>, vector<8x32xf32>
    tpu.vector_store %arg9[%c0_59, %c0_60], %207 {strides = array<i32>} : memref<8x32xf32, #tpu.memory_space<vmem>>, vector<8x32xf32>,
    return
  }
  func.func @transform_0(%arg0: i32) -> (i32, i32) {
    %c0_i32 = arith.constant 0 : i32
    %c0_i32_0 = arith.constant 0 : i32
    return %arg0, %c0_i32 : i32, i32
  }
  func.func @transform_1(%arg0: i32) -> (i32, i32) {
    %c0_i32 = arith.constant 0 : i32
    %c0_i32_0 = arith.constant 0 : i32
    %c0_i32_1 = arith.constant 0 : i32
    return %c0_i32, %c0_i32_0 : i32, i32
  }
  func.func @transform_2(%arg0: i32) -> (i32, i32) {
    %c0_i32 = arith.constant 0 : i32
    %c0_i32_0 = arith.constant 0 : i32
    %c0_i32_1 = arith.constant 0 : i32
    return %c0_i32, %c0_i32_0 : i32, i32
  }
  func.func @transform_3(%arg0: i32) -> (i32, i32) {
    %c0_i32 = arith.constant 0 : i32
    %c0_i32_0 = arith.constant 0 : i32
    %c0_i32_1 = arith.constant 0 : i32
    return %c0_i32, %c0_i32_0 : i32, i32
  }
  func.func @transform_4(%arg0: i32) -> (i32, i32) {
    %c0_i32 = arith.constant 0 : i32
    %c0_i32_0 = arith.constant 0 : i32
    %c0_i32_1 = arith.constant 0 : i32
    return %c0_i32, %c0_i32_0 : i32, i32
  }
  func.func @transform_5(%arg0: i32) -> (i32, i32) {
    %c0_i32 = arith.constant 0 : i32
    %c0_i32_0 = arith.constant 0 : i32
    %c0_i32_1 = arith.constant 0 : i32
    return %c0_i32, %c0_i32_0 : i32, i32
  }
  func.func @transform_6(%arg0: i32) -> (i32, i32, i32) {
    %c0_i32 = arith.constant 0 : i32
    %c0_i32_0 = arith.constant 0 : i32
    %c0_i32_1 = arith.constant 0 : i32
    return %arg0, %c0_i32, %c0_i32_0 : i32, i32, i32
  }
  func.func @transform_7(%arg0: i32) -> (i32, i32) {
    %c0_i32 = arith.constant 0 : i32
    %c0_i32_0 = arith.constant 0 : i32
    %c0_i32_1 = arith.constant 0 : i32
    return %c0_i32, %c0_i32_0 : i32, i32
  }
  func.func @transform_8(%arg0: i32) -> (i32, i32) {
    %c0_i32 = arith.constant 0 : i32
    %c0_i32_0 = arith.constant 0 : i32
    %c0_i32_1 = arith.constant 0 : i32
    return %c0_i32, %c0_i32_0 : i32, i32
  }
}

</mosaic_0001>

<bundles_post_ra>
// kernel: tpu_custom_call.1
= control target key start
LH: loop header
LB: loop body
LE: loop exit
PB: predicated region body
PF: predicated region fallthrough
CT: control target
= control target key end

     0   :  { %14 = vsyncpa [#allocation6], 0  ;;  %vm33_vm0 = vcmask 261120   ;;  %s7261_s0 = inlined_call_operand.vmem [shape: f32[64,32], index: 0, kind: input, shape index: {}]   ;;  %s7262_s1 = inlined_call_operand.vmem [shape: f32[32,128], index: 1, kind: input, shape index: {}]   ;;  %s7263_s2 = inlined_call_operand.vmem [shape: f32[1,128], index: 2, kind: input, shape index: {}]   ;;  %s7264_s3 = inlined_call_operand.vmem [shape: f32[8,32], index: 3, kind: input, shape index: {}]   ;;  %s7265_s4 = inlined_call_operand.vmem [shape: f32[8,32], index: 4, kind: input, shape index: {}]   ;;  %s7266_s5 = inlined_call_operand.vmem [shape: f32[32,128], index: 5, kind: input, shape index: {}]   ;;  %s7267_s6 = inlined_call_operand.hbm [shape: f32[2,8,128], index: 6, kind: output, shape index: {0}]   ;;  %s7268_s7 = inlined_call_operand.hbm [shape: f32[8,32], index: 7, kind: output, shape index: {1}]   ;;  %s7269_s8 = inlined_call_operand.hbm [shape: f32[8,32], index: 8, kind: output, shape index: {2}]  }
   0x1   :  { %v48_v0 = vld [vmem:[%s7262_s1 + $0x18] sm:$0xff]  ;;  %v47_v1 = vld [vmem:[%s7262_s1 + $0x10] sm:$0xff]  ;;  %v46_v2 = vld [vmem:[%s7262_s1 + $0x8] sm:$0xff] }
   0x2   :  { %v6282_v3 = vand.u32 4294901760, %v48_v0  ;;  %v6284_v4 = vand.u32 4294901760, %v47_v1  ;;  %v6286_v5 = vand.u32 4294901760, %v46_v2  ;;  %v45_v6 = vld [vmem:[%s7262_s1] sm:$0xff]  ;;  %v38_v8 = vld [vmem:[%s7261_s0 + $0x8] sm:$0xff]  ;;  %v39_v12 = vld [vmem:[%s7261_s0 + $0x10] sm:$0xff] }
   0x3   :  { %v37_v7 = vld [vmem:[%s7261_s0] sm:$0xff]  ;;  %v6297_v9 = vand.u32 4294901760, %v45_v6  ;;  %v61_v11 = vsel %vm33_vm0, %v38_v8, 0  ;;  %v40_v13 = vld [vmem:[%s7261_s0 + $0x18] sm:$0xff]  ;;  %v64_v19 = vsel %vm33_vm0, %v39_v12, 0 }
   0x4   :  { %v58_v10 = vsel %vm33_vm0, %v37_v7, 0  ;;  %5446 = vmatprep.subr.mxu0 %v6282_v3  ;;  %v6309_v14 = vsub.f32 %v48_v0, %v6282_v3  ;;  %v6313_v16 = vand.u32 4294901760, %v61_v11  ;;  %v6316_v17 = vsub.f32 %v47_v1, %v6284_v4  ;;  %v32_v26 = vld [vmem:[%s7264_s3] sm:$0xff] }
   0x5   :  { %v6311_v15 = vand.u32 4294901760, %v58_v10  ;;  %5447 = vmatpush3.msra.mxu0 %v6282_v3  ;;  %v6320_v18 = vsub.f32 %v46_v2, %v6286_v5  ;;  %v67_v20 = vsel %vm33_vm0, %v40_v13, 0  ;;  %v6325_v21 = vsub.f32 %v45_v6, %v6297_v9 }
   0x6   :  { %5448 = vmatprep.subr.mxu0 %v6284_v4  ;;  %v6329_v22 = vand.u32 4294901760, %v6309_v14  ;;  %v6335_v24 = vsub.f32 %v61_v11, %v6313_v16  ;;  %v6338_v25 = vand.u32 4294901760, %v6316_v17 }
   0x7   :  { %v6332_v23 = vsub.f32 %v58_v10, %v6311_v15  ;;  %5474 = vmatprep.mubr.f32.mxu1 %v6311_v15 }
   0x8   :  { %15 = vsyncpa [#allocation8], 0  ;;  %5449 = vmatpush3.msra.mxu0 %v6284_v4  ;;  %v6346_v27 = vand.u32 4294901760, %v6320_v18  ;;  %v6348_v28 = vand.u32 4294901760, %v64_v19  ;;  %v6350_v29 = vand.u32 4294901760, %v67_v20  ;;  %v6353_v30 = vand.u32 4294901760, %v6325_v21 }
   0x9   :  { %34 = vst.msk [vmem:[#allocation3] sm:$0xff] %vm33_vm0, %v32_v26  ;;  %5450 = vmatprep.subr.mxu0 %v6286_v5  ;;  %v258_v31 = vsub.f32 %v6309_v14, %v6329_v22  ;;  %v152_v32 = vand.u32 4294901760, %v6332_v23  ;;  %v162_v33 = vand.u32 4294901760, %v6335_v24  ;;  %v265_v34 = vsub.f32 %v6316_v17, %v6338_v25  ;;  %v41_v39 = vld [vmem:[%s7261_s0 + $0x20] sm:$0xff]  ;;  %v42_v40 = vld [vmem:[%s7261_s0 + $0x28] sm:$0xff]  ;;  %v43_v48 = vld [vmem:[%s7261_s0 + $0x30] sm:$0xff] }
   0xa   :  { %5451 = vmatpush3.msra.mxu0 %v6286_v5  ;;  %v272_v35 = vsub.f32 %v6320_v18, %v6346_v27  ;;  %v6367_v36 = vsub.f32 %v64_v19, %v6348_v28  ;;  %v6370_v37 = vsub.f32 %v67_v20, %v6350_v29  ;;  %v279_v38 = vsub.f32 %v6325_v21, %v6353_v30  ;;  %v44_v49 = vld [vmem:[%s7261_s0 + $0x38] sm:$0xff]  ;;  %s6222_s17 = smov 96   ;;  %s6223_s18 = smov [#allocation5]  }
   0xb   :  { %5452 = vmatprep.subr.mxu0 %v6297_v9  ;;  %v259_v41 = vand.u32 4294901760, %v258_v31  ;;  %v153_v42 = vsub.f32 %v6332_v23, %v152_v32  ;;  %v163_v43 = vsub.f32 %v6335_v24, %v162_v33  ;;  %v266_v44 = vand.u32 4294901760, %v265_v34  ;;  %s5081_s19 = sshll.u32 %s6223_s18, 4  ;;  %s5082_s19 = int_to_ptr.vmem [resolvable:$true] %s5081_s19 }
   0xc   :  { %5453 = vmatpush3.msra.mxu0 %v6297_v9  ;;  %v273_v45 = vand.u32 4294901760, %v272_v35  ;;  %v172_v46 = vand.u32 4294901760, %v6367_v36  ;;  %v182_v47 = vand.u32 4294901760, %v6370_v37  ;;  %v70_v52 = vsel %vm33_vm0, %v41_v39, 0  ;;  %s6153_s1 = scalar_lea.vmem %s5082_s19, 256  ;;  %p6158_p1 = scmp.lt.s32.totalorder %s5082_s19, %s5082_s19 }
   0xd   :  { %5466 = vmatprep.subr.mxu1 %v259_v41  ;;  %v154_v50 = vand.u32 4294901760, %v153_v42  ;;  %v164_v51 = vand.u32 4294901760, %v163_v43  ;;  %5486 = vmatprep.subr.mxu0 %v6309_v14  ;;  %v73_v53 = vsel %vm33_vm0, %v42_v40, 0  ;;  %v6405_v56 = vand.u32 4294901760, %v70_v52  ;;  %p6154_p0 = scmp.ne.s32.totalorder %s5082_s19, %s6153_s1  ;;  %p6159_p2 = scmp.lt.s32.totalorder %s6153_s1, %s6153_s1 }
   0xe   :  { %5467 = vmatpush3.msra.mxu1 %v259_v41  ;;  %v173_v54 = vsub.f32 %v6367_v36, %v172_v46  ;;  %v183_v55 = vsub.f32 %v6370_v37, %v182_v47  ;;  %v6407_v57 = vand.u32 4294901760, %v73_v53  ;;  %v280_v58 = vand.u32 4294901760, %v279_v38 }
   0xf   :  { %5454 = vmatprep.mubr.f32.mxu0 %v154_v50  ;;  %5468 = vmatprep.subr.mxu1 %v266_v44  ;;  %v76_v59 = vsel %vm33_vm0, %v43_v48, 0  ;;  %v79_v60 = vsel %vm33_vm0, %v44_v49, 0  ;;  %v6412_v63 = vsub.f32 %v70_v52, %v6405_v56  ;;  %vm6218_vm1 = vmmov 0   ;;  %v35_v49 = vld [vmem:[%s7265_s4] sm:$0xff]  ;;  %s6221_s4 = smov 32   ;;  %p6160_p3 = por %p6159_p2, %p6158_p1 }
  0x10   :  { %5455 = vmatmul.mubr.f32.vlgmr.msra.gmra.mxu0 %v164_v51  ;;  %5469 = vmatpush3.msra.mxu1 %v266_v44  ;;  %v174_v61 = vand.u32 4294901760, %v173_v54  ;;  %v184_v62 = vand.u32 4294901760, %v183_v55  ;;  %v6415_v0 = vsub.f32 %v73_v53, %v6407_v57  ;;  %v6418_v1 = vand.u32 4294901760, %v76_v59  ;;  %36 = vst.msk [vmem:[#allocation4] sm:$0xff] %vm33_vm0, %v35_v49  ;;  %v6682_v50 = vld [vmem:[%s7263_s2] ss:$0 sm:$0xff] }
  0x11   :  { %5470 = vmatprep.subr.mxu1 %v273_v45  ;;  %5487 = vmatpush3.msra.mxu0 %v6309_v14  ;;  %v6420_v2 = vand.u32 4294901760, %v79_v60  ;;  %v192_v6 = vand.u32 4294901760, %v6412_v63  ;;  %s6220_s2 = smov 64   ;;  %vm2972_vm5 = vcmask 523264   ;;  %vm2974_vm6 = vcmask 785408   ;;  %p6161_p4 = pnand %p6160_p3, %p6154_p0 }
  0x12   :  { %5457 = vmatprep.mubr.f32.mxu0 %v174_v61  ;;  %5471 = vmatpush3.msra.mxu1 %v273_v45  ;;  %v202_v7 = vand.u32 4294901760, %v6415_v0  ;;  %v6426_v8 = vsub.f32 %v76_v59, %v6418_v1 }
  0x13   :  { %5472 = vmatprep.subr.mxu1 %v280_v58  ;;  %5488 = vmatprep.subr.mxu0 %v6316_v17  ;;  %v6429_v10 = vsub.f32 %v79_v60, %v6420_v2  ;;  %v193_v11 = vsub.f32 %v6412_v63, %v192_v6 }
  0x14   :  { %5458 = vmatmul.mubr.f32.gmra.mxu0 %v184_v62  ;;  %5473 = vmatpush3.msra.mxu1 %v280_v58  ;;  %v203_v12 = vsub.f32 %v6415_v0, %v202_v7  ;;  %v212_v13 = vand.u32 4294901760, %v6426_v8 }
  0x15   :  { %5475 = vmatmul.mubr.f32.vlgmr.msra.gmra.mxu1 %v6313_v16  ;;  %5506 = vmatprep.subr.mxu1 %v6282_v3  ;;  %v222_v14 = vand.u32 4294901760, %v6429_v10  ;;  %v194_v19 = vand.u32 4294901760, %v193_v11 }
  0x16   :  { %5507 = vmatpush3.msra.mxu1 %v6282_v3  ;;  %v204_v20 = vand.u32 4294901760, %v203_v12  ;;  %5477 = vmatprep.mubr.f32.mxu1 %v6348_v28  ;;  %v213_v26 = vsub.f32 %v6426_v8, %v212_v13 }
  0x17   :  { %5489 = vmatpush3.msra.mxu0 %v6316_v17  ;;  %5508 = vmatprep.subr.mxu1 %v6284_v4  ;;  %v223_v31 = vsub.f32 %v6429_v10, %v222_v14  ;;  %v878_v17 = vld [vmem:[%s7266_s5 + $0x18] sm:$0xff] }
  0x18   :  { %5460 = vmatprep.mubr.f32.mxu0 %v194_v19  ;;  %5509 = vmatpush3.msra.mxu1 %v6284_v4  ;;  %v214_v34 = vand.u32 4294901760, %v213_v26 }
  0x19   :  { %5461 = vmatmul.mubr.f32.gmra.mxu0 %v204_v20  ;;  %5478 = vmatmul.mubr.f32.gmra.mxu1 %v6350_v29  ;;  %v224_v35 = vand.u32 4294901760, %v223_v31 }
  0x1a   :  { %5490 = vmatprep.subr.mxu0 %v6320_v18  ;;  %5480 = vmatprep.mubr.f32.mxu1 %v6405_v56 }
  0x1b   :  { %5463 = vmatprep.mubr.f32.mxu0 %v214_v34  ;;  %5491 = vmatpush3.msra.mxu0 %v6320_v18  ;;  %v6472_v18 = vand.u32 4294901760, %v878_v17 }
  0x1c   :  { %5492 = vmatprep.subr.mxu0 %v6325_v21  ;;  %5510 = vmatprep.subr.mxu1 %v6286_v5 }
  0x1d   :  { %5464 = vmatmul.mubr.f32.gmra.mxu0 %v224_v35  ;;  %5481 = vmatmul.mubr.f32.gmra.mxu1 %v6407_v57 }
  0x1e   :  { %5493 = vmatpush3.msra.mxu0 %v6325_v21  ;;  %5494 = vmatprep.mubr.f32.mxu0 %v6332_v23  ;;  %v877_v21 = vld [vmem:[%s7266_s5 + $0x10] sm:$0xff]  ;;  %v6488_v23 = vsub.f32 %v878_v17, %v6472_v18 }
  0x1f   :  { %5511 = vmatpush3.msra.mxu1 %v6286_v5  ;;  %5483 = vmatprep.mubr.f32.mxu1 %v6418_v1 }
  0x20   :  { %5512 = vmatprep.subr.mxu1 %v6297_v9  ;;  %5526 = vmatprep.subr.mxu0 %v6329_v22 }
  0x21   :  { %5495 = vmatmul.mubr.f32.vlgmr.msra.gmra.mxu0 %v6335_v24  ;;  %5484 = vmatmul.mubr.f32.gmra.mxu1 %v6420_v2  ;;  %v876_v24 = vld [vmem:[%s7266_s5 + $0x8] sm:$0xff] }
  0x22   :  { %5497 = vmatprep.mubr.f32.mxu0 %v6367_v36  ;;  %5513 = vmatpush3.msra.mxu1 %v6297_v9  ;;  %v6515_v36 = vand.u32 4294901760, %v876_v24 }
  0x23   :  { %5514 = vmatprep.mubr.f32.mxu1 %v152_v32  ;;  %5527 = vmatpush3.msra.mxu0 %v6329_v22  ;;  %v6490_v22 = vand.u32 4294901760, %v877_v21  ;;  %v886_v32 = vld [vmem:[#allocation3] sm:$0xff] }
  0x24   :  { %5546 = vmatprep.subr.mxu1 %v6282_v3  ;;  %5528 = vmatprep.subr.mxu0 %v6338_v25  ;;  %v6540_v40 = vsub.f32 %v876_v24, %v6515_v36 }
  0x25   :  { %5498 = vmatmul.mubr.f32.gmra.mxu0 %v6370_v37  ;;  %5515 = vmatmul.mubr.f32.vlgmr.msra.gmra.mxu1 %v162_v33  ;;  %v890_v33 = vsel %vm33_vm0, %v886_v32, 0  ;;  %v875_v37 = vld [vmem:[%s7266_s5] sm:$0xff] }
  0x26   :  { %5500 = vmatprep.mubr.f32.mxu0 %v6412_v63  ;;  %5547 = vmatpush3.msra.mxu1 %v6282_v3  ;;  %v6506_v3 = vand.u32 4294901760, %v6488_v23  ;;  %v6534_v39 = vand.u32 4294901760, %v875_v37  ;;  %v6562_v44 = vand.u32 4294901760, %v6540_v40 }
  0x27   :  { %5517 = vmatprep.mubr.f32.mxu1 %v172_v46  ;;  %5529 = vmatpush3.msra.mxu0 %v6338_v25  ;;  %v6509_v25 = vsub.f32 %v877_v21, %v6490_v22 }
  0x28   :  { %5548 = vmatprep.subr.mxu1 %v6284_v4  ;;  %5530 = vmatprep.subr.mxu0 %v6346_v27  ;;  %v6557_v43 = vsub.f32 %v875_v37, %v6534_v39  ;;  %v1013_v46 = vsub.f32 %v6540_v40, %v6562_v44 }
  0x29   :  { %5501 = vmatmul.mubr.f32.gmra.mxu0 %v6415_v0  ;;  %5518 = vmatmul.mubr.f32.gmra.mxu1 %v182_v47  ;;  %v6532_v38 = vand.u32 4294901760, %v6509_v25 }
  0x2a   :  { %5503 = vmatprep.mubr.f32.mxu0 %v6426_v8  ;;  %5549 = vmatpush3.msra.mxu1 %v6284_v4  ;;  %v6525_v4 = vand.u32 4294901760, %v890_v33  ;;  %v6574_v45 = vand.u32 4294901760, %v6557_v43  ;;  %v6591_v47 = vand.u32 4294901760, %v1013_v46 }
  0x2b   :  { %5520 = vmatprep.mubr.f32.mxu1 %v192_v6  ;;  %5531 = vmatpush3.msra.mxu0 %v6346_v27  ;;  %v999_v27 = vsub.f32 %v6488_v23, %v6506_v3  ;;  %v1006_v42 = vsub.f32 %v6509_v25, %v6532_v38 }
  0x2c   :  { %5532 = vmatprep.subr.mxu0 %v6353_v30  ;;  %5550 = vmatprep.subr.mxu1 %v6286_v5  ;;  %v6548_v41 = vsub.f32 %v890_v33, %v6525_v4 }
  0x2d   :  { %5504 = vmatmul.mubr.f32.gmra.mxu0 %v6429_v10  ;;  %5521 = vmatmul.mubr.f32.gmra.mxu1 %v202_v7 }
  0x2e   :  { %5533 = vmatpush3.msra.mxu0 %v6353_v30  ;;  %5534 = vmatprep.mubr.f32.mxu0 %v6311_v15  ;;  %v6217_v30 = vmov 0.0  }
  0x2f   :  { %5551 = vmatpush3.msra.mxu1 %v6286_v5  ;;  %5523 = vmatprep.mubr.f32.mxu1 %v212_v13  ;;  %v6552_v5 = vand.u32 4294901760, %v999_v27 }
  0x30   :  { %5552 = vmatprep.subr.mxu1 %v6297_v9  ;;  %5566 = vmatprep.subr.mxu0 %v6217_v30 }
  0x31   :  { %5535 = vmatmul.mubr.f32.vlgmr.msra.gmra.mxu0 %v6313_v16  ;;  %5524 = vmatmul.mubr.f32.gmra.mxu1 %v222_v14 }
  0x32   :  { %5537 = vmatprep.mubr.f32.mxu0 %v6348_v28  ;;  %5553 = vmatpush3.msra.mxu1 %v6297_v9  ;;  %v963_v9 = vand.u32 4294901760, %v6548_v41 }
  0x33   :  { %5554 = vmatprep.mubr.f32.mxu1 %v6311_v15  ;;  %5567 = vmatpush3.msra.mxu0 %v6472_v18  ;;  %v6571_v15 = vand.u32 4294901760, %v1006_v42 }
  0x34   :  { %5577 = vmatprep.subr.mxu1 %v6217_v30  ;;  %5568 = vmatprep.subr.mxu0 %v6217_v30 }
  0x35   :  { %5538 = vmatmul.mubr.f32.gmra.mxu0 %v6350_v29  ;;  %5555 = vmatmul.mubr.f32.vlgmr.msra.gmra.mxu1 %v6313_v16  ;;  %v964_v16 = vsub.f32 %v6548_v41, %v963_v9 }
  0x36   :  { %5540 = vmatprep.mubr.f32.mxu0 %v6405_v56  ;;  %5578 = vmatpush3.msra.mxu1 %v6552_v5 }
  0x37   :  { %5557 = vmatprep.mubr.f32.mxu1 %v6348_v28  ;;  %5569 = vmatpush3.msra.mxu0 %v6490_v22  ;;  %v1020_v28 = vsub.f32 %v6557_v43, %v6574_v45 }
  0x38   :  { %5579 = vmatprep.subr.mxu1 %v6217_v30  ;;  %5570 = vmatprep.subr.mxu0 %v6217_v30 }
  0x39   :  { %5541 = vmatmul.mubr.f32.gmra.mxu0 %v6407_v57  ;;  %5558 = vmatmul.mubr.f32.gmra.mxu1 %v6350_v29  ;;  %v965_v29 = vand.u32 4294901760, %v964_v16  ;;  %v6600_v48 = vand.u32 4294901760, %v1020_v28 }
  0x3a   :  { %5543 = vmatprep.mubr.f32.mxu0 %v6418_v1  ;;  %5580 = vmatpush3.msra.mxu1 %v6571_v15 }
  0x3b   :  { %5571 = vmatpush3.msra.mxu0 %v6515_v36  ;;  %5560 = vmatprep.mubr.f32.mxu1 %v6405_v56 }
  0x3c   :  { %5572 = vmatprep.subr.mxu0 %v6217_v30  ;;  %5581 = vmatprep.subr.mxu1 %v6217_v30 }
  0x3d   :  { %5544 = vmatmul.mubr.f32.gmra.mxu0 %v6420_v2  ;;  %5561 = vmatmul.mubr.f32.gmra.mxu1 %v6407_v57 }
  0x3e   :  { %5573 = vmatpush3.msra.mxu0 %v6534_v39  ;;  %5574 = vmatprep.mubr.msk.f32.mxu0 %vm6218_vm1, %v6217_v30 }
  0x3f   :  { %5582 = vmatpush3.msra.mxu1 %v6591_v47  ;;  %5588 = vmatprep.subr.mxu0 %v6217_v30 }
  0x40   :  { %5563 = vmatprep.mubr.f32.mxu1 %v6418_v1  ;;  %5583 = vmatprep.subr.mxu1 %v6217_v30 }
  0x41   :  { %5575 = vmatmul.mubr.f32.vlgmr.msra.gmra.mxu0 %v965_v29  ;;  %5564 = vmatmul.mubr.f32.gmra.mxu1 %v6420_v2 }
  0x42   :  { %5589 = vmatpush3.msra.mxu0 %v6488_v23  ;;  %5584 = vmatpush3.msra.mxu1 %v6600_v48 }
  0x43   :  { %5590 = vmatprep.subr.mxu0 %v6217_v30  ;;  %5585 = vmatprep.mubr.msk.f32.mxu1 %vm6218_vm1, %v6217_v30 }
  0x44   :  { %5591 = vmatpush3.msra.mxu0 %v6509_v25  ;;  %5599 = vmatprep.subr.mxu1 %v6217_v30 }
  0x45   :  { %5592 = vmatprep.subr.mxu0 %v6217_v30  ;;  %5586 = vmatmul.mubr.f32.vlgmr.msra.gmra.mxu1 %v6525_v4 }
  0x46   :  { %5593 = vmatpush3.msra.mxu0 %v6540_v40  ;;  %5600 = vmatpush3.msra.mxu1 %v6472_v18 }
  0x47   :  { %5594 = vmatprep.subr.mxu0 %v6217_v30  ;;  %5596 = vmatprep.mubr.msk.f32.mxu0 %vm6218_vm1, %v6217_v30 }
  0x48   :  { %5595 = vmatpush3.msra.mxu0 %v6557_v43  ;;  %5601 = vmatprep.subr.mxu1 %v6217_v30 }
  0x49   :  { %5610 = vmatprep.subr.mxu0 %v6217_v30  ;;  %5597 = vmatmul.mubr.f32.vlgmr.msra.gmra.mxu0 %v6548_v41 }
  0x4a   :  { %5602 = vmatpush3.msra.mxu1 %v6490_v22  ;;  %5611 = vmatpush3.msra.mxu0 %v6506_v3 }
  0x4b   :  { %5603 = vmatprep.subr.mxu1 %v6217_v30  ;;  %5612 = vmatprep.subr.mxu0 %v6217_v30 }
  0x4c   :  { %5604 = vmatpush3.msra.mxu1 %v6515_v36  ;;  %5613 = vmatpush3.msra.mxu0 %v6532_v38 }
  0x4d   :  { %5605 = vmatprep.subr.mxu1 %v6217_v30  ;;  %5614 = vmatprep.subr.mxu0 %v6217_v30 }
  0x4e   :  { %5606 = vmatpush3.msra.mxu1 %v6534_v39  ;;  %5607 = vmatprep.mubr.msk.f32.mxu1 %vm6218_vm1, %v6217_v30 }
  0x4f   :  { %5615 = vmatpush3.msra.mxu0 %v6562_v44  ;;  %5608 = vmatmul.mubr.f32.vlgmr.msra.gmra.mxu1 %v963_v9 }
  0x50   :  { %5616 = vmatprep.subr.mxu0 %v6217_v30  ;;  %5621 = vmatprep.subr.mxu1 %v6217_v30 }
  0x51   :  { %5617 = vmatpush3.msra.mxu0 %v6574_v45  ;;  %5618 = vmatprep.mubr.msk.f32.mxu0 %vm6218_vm1, %v6217_v30 }
  0x52   :  { %5622 = vmatpush3.msra.mxu1 %v6472_v18  ;;  %5619 = vmatmul.mubr.f32.vlgmr.msra.gmra.mxu0 %v6525_v4 }
  0x53   :  { %5623 = vmatprep.subr.mxu1 %v6217_v30  ;;  %5629 = vmatprep.mubr.msk.f32.mxu1 %vm6218_vm1, %v6217_v30 }
  0x54   :  { %5624 = vmatpush3.msra.mxu1 %v6490_v22  ;;  %5632 = vmatprep.subr.mxu0 %v6217_v30 }
  0x55   :  { %5625 = vmatprep.subr.mxu1 %v6217_v30  ;;  %5633 = vmatpush3.msra.mxu0 %v6472_v18 }
  0x56   :  { %5626 = vmatpush3.msra.mxu1 %v6515_v36  ;;  %5634 = vmatprep.subr.mxu0 %v6217_v30 }
  0x57   :  { %5627 = vmatprep.subr.mxu1 %v6217_v30  ;;  %5635 = vmatpush3.msra.mxu0 %v6490_v22 }
  0x58   :  { %5628 = vmatpush3.msra.mxu1 %v6534_v39  ;;  %5636 = vmatprep.subr.mxu0 %v6217_v30 }
  0x59   :  { %5630 = vmatmul.mubr.f32.vlgmr.msra.gmra.mxu1 %v6525_v4  ;;  %5643 = vmatprep.subr.mxu1 %v6217_v30 }
  0x5a   :  { %5644 = vmatpush3.msra.mxu1 %v6552_v5  ;;  %5651 = vmatprep.mubr.msk.f32.mxu1 %vm6218_vm1, %v6217_v30 }
  0x5b   :  { %5645 = vmatprep.subr.mxu1 %v6217_v30  ;;  %5637 = vmatpush3.msra.mxu0 %v6515_v36 }
  0x5c   :  { %5646 = vmatpush3.msra.mxu1 %v6571_v15  ;;  %5638 = vmatprep.subr.mxu0 %v6217_v30 }
  0x5d   :  { %5647 = vmatprep.subr.mxu1 %v6217_v30  ;;  %5639 = vmatpush3.msra.mxu0 %v6534_v39 }
  0x5e   :  { %5648 = vmatpush3.msra.mxu1 %v6591_v47  ;;  %5640 = vmatprep.mubr.msk.f32.mxu0 %vm6218_vm1, %v6217_v30 }
  0x5f   :  { %5649 = vmatprep.subr.mxu1 %v6217_v30  ;;  %5654 = vmatprep.subr.mxu0 %v6217_v30 }
  0x60   :  { %5650 = vmatpush3.msra.mxu1 %v6600_v48 }
  0x61   :  { %5665 = vmatprep.subr.mxu1 %v6217_v30 }
  0xd0   :  { %v5456_v51 = vpop.f32.mrf.mxu0 }
  0xd1   :  { %v167_v52 = vadd.f32 %v5456_v51, %v6682_v50 }
  0xd2   :  { %v6685_v53 = vpop.f32.mrf.mxu0 }
  0xd4   :  { %v5459_v54 = vpop.f32.mrf.mxu0 }
  0xd5   :  { %v187_v55 = vadd.f32 %v5459_v54, %v6682_v50  ;;  %v5476_v56 = vpop.f32.mrf.mxu1 }
  0xd6   :  { %v176_v57 = vpop.f32.mrf.mxu0  ;;  %v324_v58 = vadd.f32 %v5476_v56, %v167_v52 }
  0xd7   :  { %v177_v59 = vadd.f32 %v6682_v50, %v176_v57  ;;  %v6689_v60 = vpop.f32.mrf.mxu1 }
  0xd9   :  { %v5462_v61 = vpop.f32.mrf.mxu0  ;;  %v5479_v62 = vpop.f32.mrf.mxu1 }
  0xda   :  { %v207_v63 = vadd.f32 %v5462_v61, %v6682_v50  ;;  %v336_v0 = vadd.f32 %v5479_v62, %v187_v55 }
  0xdb   :  { %v196_v1 = vpop.f32.mrf.mxu0  ;;  %v329_v2 = vpop.f32.mrf.mxu1 }
  0xdc   :  { %v197_v6 = vadd.f32 %v6682_v50, %v196_v1  ;;  %v330_v7 = vadd.f32 %v329_v2, %v177_v59 }
  0xdd   :  { %v5465_v8 = vpop.f32.mrf.mxu0  ;;  %v5482_v10 = vpop.f32.mrf.mxu1 }
  0xde   :  { %v227_v11 = vadd.f32 %v5465_v8, %v6682_v50  ;;  %v348_v12 = vadd.f32 %v5482_v10, %v207_v63 }
  0xdf   :  { %v216_v13 = vpop.f32.mrf.mxu0  ;;  %v341_v14 = vpop.f32.mrf.mxu1 }
  0xe0   :  { %v217_v19 = vadd.f32 %v6682_v50, %v216_v13  ;;  %v342_v20 = vadd.f32 %v341_v14, %v197_v6 }
  0xe1   :  { %v5496_v26 = vpop.f32.mrf.mxu0  ;;  %v5485_v31 = vpop.f32.mrf.mxu1 }
  0xe2   :  { %v447_v34 = vadd.f32 %v5496_v26, %v324_v58  ;;  %v360_v35 = vadd.f32 %v5485_v31, %v227_v11 }
  0xe3   :  { %v6695_v17 = vpop.f32.mrf.mxu0  ;;  %v353_v21 = vpop.f32.mrf.mxu1 }
  0xe4   :  { %v354_v32 = vadd.f32 %v353_v21, %v217_v19 }
  0xe5   :  { %v5499_v24 = vpop.f32.mrf.mxu0  ;;  %v5516_v33 = vpop.f32.mrf.mxu1 }
  0xe6   :  { %v461_v37 = vadd.f32 %v5499_v24, %v336_v0  ;;  %v574_v4 = vadd.f32 %v5516_v33, %v447_v34 }
  0xe7   :  { %v453_v27 = vpop.f32.mrf.mxu0  ;;  %v6697_v41 = vpop.f32.mrf.mxu1 }
  0xe8   :  { %v454_v42 = vadd.f32 %v453_v27, %v330_v7 }
  0xe9   :  { %v5502_v9 = vpop.f32.mrf.mxu0  ;;  %v5519_v46 = vpop.f32.mrf.mxu1 }
  0xea   :  { %v475_v16 = vadd.f32 %v5502_v9, %v348_v12  ;;  %v590_v28 = vadd.f32 %v5519_v46, %v461_v37 }
  0xeb   :  { %v467_v29 = vpop.f32.mrf.mxu0  ;;  %v581_v49 = vpop.f32.mrf.mxu1 }
  0xec   :  { %v468_v51 = vadd.f32 %v467_v29, %v342_v20  ;;  %v582_v52 = vadd.f32 %v581_v49, %v454_v42 }
  0xed   :  { %v5505_v54 = vpop.f32.mrf.mxu0  ;;  %v5522_v55 = vpop.f32.mrf.mxu1 }
  0xee   :  { %v489_v56 = vadd.f32 %v5505_v54, %v360_v35  ;;  %v606_v57 = vadd.f32 %v5522_v55, %v475_v16 }
  0xef   :  { %v481_v58 = vpop.f32.mrf.mxu0  ;;  %v597_v59 = vpop.f32.mrf.mxu1 }
  0xf0   :  { %v482_v61 = vadd.f32 %v481_v58, %v354_v32  ;;  %v598_v62 = vadd.f32 %v597_v59, %v468_v51 }
  0xf1   :  { %v5536_v63 = vpop.f32.mrf.mxu0  ;;  %v5525_v0 = vpop.f32.mrf.mxu1 }
  0xf2   :  { %v711_v1 = vadd.f32 %v5536_v63, %v574_v4  ;;  %v622_v2 = vadd.f32 %v5525_v0, %v489_v56  ;;  %v157_v63 = vadd.f32 %v6682_v50, %v6685_v53  ;;  %v879_v53 = vlaneseq }
  0xf3   :  { %v704_v6 = vpop.f32.mrf.mxu0  ;;  %v613_v7 = vpop.f32.mrf.mxu1 }
  0xf4   :  { %v614_v8 = vadd.f32 %v613_v7, %v482_v61 }
  0xf5   :  { %v5539_v10 = vpop.f32.mrf.mxu0  ;;  %v5556_v11 = vpop.f32.mrf.mxu1 }
  0xf6   :  { %v723_v12 = vadd.f32 %v5539_v10, %v590_v28  ;;  %v6699_v13 = vadd.f32 %v5556_v11, %v711_v1  ;;  %v318_v1 = vadd.f32 %v6689_v60, %v157_v63 }
  0xf7   :  { %v716_v14 = vpop.f32.mrf.mxu0  ;;  %v821_v19 = vpop.f32.mrf.mxu1 }
  0xf8   :  { %v717_v20 = vadd.f32 %v716_v14, %v582_v52 }
  0xf9   :  { %v5542_v26 = vpop.f32.mrf.mxu0  ;;  %v5559_v31 = vpop.f32.mrf.mxu1 }
  0xfa   :  { %v735_v34 = vadd.f32 %v5542_v26, %v606_v57  ;;  %v6701_v35 = vadd.f32 %v5559_v31, %v723_v12 }
  0xfb   :  { %v728_v21 = vpop.f32.mrf.mxu0  ;;  %v833_v32 = vpop.f32.mrf.mxu1 }
  0xfc   :  { %v729_v24 = vadd.f32 %v728_v21, %v598_v62  ;;  %v6703_v33 = vadd.f32 %v833_v32, %v717_v20 }
  0xfd   :  { %v5545_v37 = vpop.f32.mrf.mxu0  ;;  %v5562_v4 = vpop.f32.mrf.mxu1 }
  0xfe   :  { %v747_v27 = vadd.f32 %v5545_v37, %v622_v2  ;;  %v6705_v42 = vadd.f32 %v5562_v4, %v735_v34  ;;  %v880_v37 = vand.u32 127, %v879_v53 }
  0xff   :  { %v740_v9 = vpop.f32.mrf.mxu0  ;;  %v845_v46 = vpop.f32.mrf.mxu1 }
 0x100   :  { %v741_v16 = vadd.f32 %v740_v9, %v614_v8  ;;  %v6707_v28 = vadd.f32 %v845_v46, %v729_v24  ;;  %v440_v8 = vadd.f32 %v6695_v17, %v318_v1  ;;  %vm881_vm2 = vcmp.ge.s32.totalorder %v880_v37, 64  ;;  %v887_v9 = vld [vmem:[#allocation4] sm:$0xff] }
 0x101   :  { %v5565_v29 = vpop.f32.mrf.mxu1  ;;  %v967_v49 = vpop.f32.mrf.mxu0  ;;  %vm882_vm3 = vcmp.lt.s32.totalorder %v880_v37, 96  ;;  %v6219_v17 = vmov 1.0  }
 0x102   :  { %v6709_v51 = vadd.f32 %v5565_v29, %v747_v27  ;;  %v566_v12 = vadd.f32 %v6697_v41, %v440_v8  ;;  %vm883_vm4 = vmand %vm881_vm2, %vm882_vm3 }
 0x103   :  { %v857_v52 = vpop.f32.mrf.mxu1  ;;  %v5576_v54 = vpop.f32.mrf.mxu0  ;;  %v6718_v4 = vsel %vm883_vm4, 2.0, %v6219_v17 }
 0x104   :  { %v6711_v55 = vadd.f32 %v857_v52, %v741_v16  ;;  %v705_v14 = vadd.f32 %v704_v6, %v566_v12  ;;  %v6721_v6 = vsel %vm883_vm4, -1.0, %v6217_v30 }
 0x105   :  { %v1058_v56 = vpop.f32.mrf.mxu1 }
 0x106   :  { %v1059_v61 = vadd.f32 %v1058_v56, %v967_v49  ;;  %v822_v31 = vadd.f32 %v821_v19, %v705_v14 }
 0x107   :  { %v5587_v57 = vpop.f32.mrf.mxu1 }
 0x109   :  { %v1138_v58 = vpop.f32.mrf.mxu0 }
 0x10a   :  { %v1139_v2 = vadd.f32 %v1138_v58, %v1059_v61 }
 0x10b   :  { %v5598_v59 = vpop.f32.mrf.mxu0 }
 0x10f   :  { %v1215_v62 = vpop.f32.mrf.mxu1 }
 0x110   :  { %v1216_v10 = vadd.f32 %v1215_v62, %v1139_v2 }
 0x111   :  { %v5609_v0 = vpop.f32.mrf.mxu1 }
 0x112   :  { %v1298_v7 = vpop.f32.mrf.mxu0 }
 0x113   :  { %v1299_v20 = vadd.f32 %v1298_v7, %v1216_v10 }
 0x114   :  { %v5620_v11 = vpop.f32.mrf.mxu0 }
 0x119   :  { %v1373_v26 = vpop.f32.mrf.mxu1 }
 0x11a   :  { %v1374_v34 = vadd.f32 %v1373_v26, %v1299_v20 }
 0x11b   :  { %v5631_v21 = vpop.f32.mrf.mxu1 }
 0x11c   :  { %v1377_v32 = vadd.f32 %v1374_v34, %v822_v31 }
 0x11e   :  { %v5126_v24 = vmul.f32 -1.442695, %v1377_v32 }
 0x120   :  { %6105 = vpow2.f32 %v5126_v24 }
 0x12d   :  { %v6106_v50 = vpop.eup %6105 }
 0x12e   :  { %v1381_v60 = vadd.f32 1.0, %v6106_v50 }
 0x130   :  { %6107 = vrcp.f32 %v1381_v60 }
 0x13d   :  { %v6108_v41 = vpop.eup %6107 }
 0x13e   :  { %v1384_v19 = vmul.f32 %v6108_v41, %v6718_v4 }
 0x140   :  { %v1385_v27 = vadd.f32 %v1384_v19, %v6721_v6 }
 0x142   :  { %1392 = vrot.lane.b32.xlu0 %v1385_v27, %s6220_s2 }
 0x146   :  { %1387 = vrot.lane.b32.xlu0 %v887_v9, %s6221_s4 }
 0x1b4   :  { %v1393_v46 = vpop.permute.xlu0 %1392 }
 0x1b5   :  { %v1395_v16 = vmul.f32 %v1393_v46, %v1385_v27 }
 0x1b7   :  { %1397 = vrot.lane.b32.xlu1 %v1395_v16, %s6221_s4 }
 0x1b8   :  { %v1388_v29 = vpop.permute.xlu0 %1387 }
 0x1b9   :  { %v1390_v49 = vmul.f32 %v1388_v29, %v1385_v27 }
 0x229   :  { %v1398_v52 = vpop.permute.xlu1 %1397 }
 0x22a   :  { %v6728_v54 = vadd.f32 %v1398_v52, %v1390_v49 }
 0x22c   :  { %6109 = vtanh.f32 %v6728_v54 }
 0x239   :  { %v6110_v56 = vpop.eup %6109 }
 0x23a   :  { %1403 = vrot.lane.b32.xlu1 %v6110_v56, %s6220_s2 }
 0x2ac   :  { %v1404_v57 = vpop.permute.xlu1 %1403 }
 0x2ad   :  { %v1406_v58 = vmul.f32 %v1404_v57, %v1385_v27 }
 0x2af   :  { %1411 = vrot.lane.b32.xlu0 %v1406_v58, %s6221_s4 }
 0x321   :  { %v6733_v59 = vpop.permute.xlu0 %1411 }
 0x322   :  { %v1413_v61 = vsel %vm33_vm0, %v6733_v59, 0 }
 0x323   :  { %v1484_v62 = vand.u32 4294901760, %v1413_v61 }
 0x325   :  { %v1485_v63 = vsub.f32 %v1413_v61, %v1484_v62  ;;  %5652 = vmatmul.mubr.f32.vlgmr.msra.gmra.mxu1 %v1484_v62 }
 0x326   :  { %5666 = vmatpush3.msra.mxu1 %v6472_v18  ;;  %5673 = vmatprep.mubr.msk.f32.mxu1 %vm6218_vm1, %v6217_v30 }
 0x327   :  { %v1486_v0 = vand.u32 4294901760, %v1485_v63  ;;  %5667 = vmatprep.subr.mxu1 %v6217_v30 }
 0x328   :  { %5668 = vmatpush3.msra.mxu1 %v6490_v22 }
 0x329   :  { %v1487_v1 = vsub.f32 %v1485_v63, %v1486_v0  ;;  %5669 = vmatprep.subr.mxu1 %v6217_v30 }
 0x32a   :  { %5670 = vmatpush3.msra.mxu1 %v6515_v36 }
 0x32b   :  { %5671 = vmatprep.subr.mxu1 %v6217_v30  ;;  %v1488_v2 = vand.u32 4294901760, %v1487_v1 }
 0x32c   :  { %5672 = vmatpush3.msra.mxu1 %v6534_v39 }
 0x32d   :  { %5674 = vmatmul.mubr.f32.vlgmr.msra.gmra.mxu1 %v1486_v0  ;;  %5687 = vmatprep.subr.mxu1 %v6217_v30 }
 0x32e   :  { %5641 = vmatmul.mubr.f32.vlgmr.msra.gmra.mxu0 %v1488_v2  ;;  %5688 = vmatpush3.msra.mxu1 %v6472_v18 }
 0x32f   :  { %5655 = vmatpush3.msra.mxu0 %v6488_v23  ;;  %5689 = vmatprep.subr.mxu1 %v6217_v30 }
 0x330   :  { %5656 = vmatprep.subr.mxu0 %v6217_v30  ;;  %5690 = vmatpush3.msra.mxu1 %v6490_v22 }
 0x331   :  { %5657 = vmatpush3.msra.mxu0 %v6509_v25  ;;  %5691 = vmatprep.subr.mxu1 %v6217_v30 }
 0x332   :  { %5658 = vmatprep.subr.mxu0 %v6217_v30  ;;  %5692 = vmatpush3.msra.mxu1 %v6515_v36 }
 0x333   :  { %5659 = vmatpush3.msra.mxu0 %v6540_v40  ;;  %5693 = vmatprep.subr.mxu1 %v6217_v30 }
 0x334   :  { %5660 = vmatprep.subr.mxu0 %v6217_v30  ;;  %5662 = vmatprep.mubr.msk.f32.mxu0 %vm6218_vm1, %v6217_v30 }
 0x335   :  { %5661 = vmatpush3.msra.mxu0 %v6557_v43  ;;  %5694 = vmatpush3.msra.mxu1 %v6534_v39 }
 0x336   :  { %5695 = vmatprep.mubr.msk.f32.mxu1 %vm6218_vm1, %v6217_v30  ;;  %5663 = vmatmul.mubr.f32.vlgmr.msra.gmra.mxu0 %v1485_v63 }
 0x337   :  { %5676 = vmatprep.subr.mxu0 %v6217_v30  ;;  %5696 = vmatmul.mubr.f32.vlgmr.msra.gmra.mxu1 %v1484_v62 }
 0x338   :  { %5677 = vmatpush3.msra.mxu0 %v6506_v3  ;;  %5684 = vmatprep.mubr.msk.f32.mxu0 %vm6218_vm1, %v6217_v30 }
 0x339   :  { %5678 = vmatprep.subr.mxu0 %v6217_v30  ;;  %5709 = vmatprep.subr.mxu1 %v6217_v30 }
 0x33a   :  { %5679 = vmatpush3.msra.mxu0 %v6532_v38  ;;  %5710 = vmatpush3.msra.mxu1 %v6552_v5 }
 0x33b   :  { %5680 = vmatprep.subr.mxu0 %v6217_v30  ;;  %5711 = vmatprep.subr.mxu1 %v6217_v30 }
 0x33c   :  { %5681 = vmatpush3.msra.mxu0 %v6562_v44  ;;  %5712 = vmatpush3.msra.mxu1 %v6571_v15 }
 0x33d   :  { %5682 = vmatprep.subr.mxu0 %v6217_v30  ;;  %5713 = vmatprep.subr.mxu1 %v6217_v30 }
 0x33e   :  { %5683 = vmatpush3.msra.mxu0 %v6574_v45  ;;  %5714 = vmatpush3.msra.mxu1 %v6591_v47 }
 0x33f   :  { %5685 = vmatmul.mubr.f32.vlgmr.msra.gmra.mxu0 %v1484_v62  ;;  %5715 = vmatprep.subr.mxu1 %v6217_v30 }
 0x340   :  { %5716 = vmatpush3.msra.mxu1 %v6600_v48  ;;  %5698 = vmatprep.subr.mxu0 %v6217_v30 }
 0x341   :  { %5717 = vmatprep.mubr.msk.f32.mxu1 %vm6218_vm1, %v6217_v30  ;;  %5731 = vmatprep.subr.mxu1 %v6217_v30 }
 0x342   :  { %5699 = vmatpush3.msra.mxu0 %v6472_v18  ;;  %5706 = vmatprep.mubr.msk.f32.mxu0 %vm6218_vm1, %v6217_v30 }
 0x343   :  { %5700 = vmatprep.subr.mxu0 %v6217_v30 }
 0x344   :  { %5701 = vmatpush3.msra.mxu0 %v6490_v22 }
 0x345   :  { %5702 = vmatprep.subr.mxu0 %v6217_v30 }
 0x346   :  { %5703 = vmatpush3.msra.mxu0 %v6515_v36 }
 0x347   :  { %5704 = vmatprep.subr.mxu0 %v6217_v30 }
 0x348   :  { %5705 = vmatpush3.msra.mxu0 %v6534_v39 }
 0x349   :  { %5720 = vmatprep.subr.mxu0 %v6217_v30 }
 0x3e5   :  { %v1581_v7 = vpop.f32.mrf.mxu1 }
 0x3e7   :  { %v5653_v8 = vpop.f32.mrf.mxu1 }
 0x3ed   :  { %v1738_v10 = vpop.f32.mrf.mxu1 }
 0x3ee   :  { %v1490_v11 = vpop.f32.mrf.mxu0 }
 0x3ef   :  { %v5675_v12 = vpop.f32.mrf.mxu1  ;;  %v1582_v31 = vadd.f32 %v1581_v7, %v1490_v11 }
 0x3f0   :  { %v5642_v14 = vpop.f32.mrf.mxu0 }
 0x3f6   :  { %v1661_v20 = vpop.f32.mrf.mxu0 }
 0x3f7   :  { %v1896_v26 = vpop.f32.mrf.mxu1  ;;  %v1662_v32 = vadd.f32 %v1661_v20, %v1582_v31 }
 0x3f8   :  { %v5664_v34 = vpop.f32.mrf.mxu0 }
 0x3f9   :  { %v5697_v21 = vpop.f32.mrf.mxu1  ;;  %v1739_v24 = vadd.f32 %v1738_v10, %v1662_v32 }
 0x3ff   :  { %v1821_v50 = vpop.f32.mrf.mxu0 }
 0x400   :  { %v1822_v53 = vadd.f32 %v1821_v50, %v1739_v24 }
 0x401   :  { %v5686_v60 = vpop.f32.mrf.mxu0 }
 0x402   :  { %v1897_v37 = vadd.f32 %v1896_v26, %v1822_v53 }
 0x404   :  { %v1900_v17 = vadd.f32 %v1897_v37, %v6699_v13 }
 0x406   :  { %v5127_v41 = vmul.f32 -1.442695, %v1900_v17 }
 0x408   :  { %6111 = vpow2.f32 %v5127_v41 }
 0x415   :  { %v6112_v19 = vpop.eup %6111 }
 0x416   :  { %v1904_v27 = vadd.f32 1.0, %v6112_v19 }
 0x418   :  { %6113 = vrcp.f32 %v1904_v27 }
 0x425   :  { %v6114_v9 = vpop.eup %6113 }
 0x426   :  { %v1907_v46 = vmul.f32 %v6114_v9, %v6718_v4 }
 0x428   :  { %v1908_v16 = vadd.f32 %v1907_v46, %v6721_v6 }
 0x42a   :  { %1911 = vrot.lane.b32.xlu1 %v1908_v16, %s6220_s2  ;;  %v1909_v52 = vmul.f32 %v1908_v16, %v6728_v54 }
 0x49c   :  { %v1912_v29 = vpop.permute.xlu1 %1911 }
 0x49d   :  { %v1914_v49 = vmul.f32 %v1912_v29, %v1908_v16 }
 0x49f   :  { %1916 = vrot.lane.b32.xlu0 %v1914_v49, %s6221_s4 }
 0x511   :  { %v1917_v56 = vpop.permute.xlu0 %1916 }
 0x512   :  { %v6803_v13 = vadd.f32 %v1917_v56, %v1909_v52 }
 0x514   :  { %6115 = vtanh.f32 %v6803_v13 }
 0x521   :  { %v6116_v57 = vpop.eup %6115 }
 0x522   :  { %1922 = vrot.lane.b32.xlu1 %v6116_v57, %s6220_s2 }
 0x594   :  { %v1923_v58 = vpop.permute.xlu1 %1922 }
 0x595   :  { %v6807_v61 = vmul.f32 %v1923_v58, %v1908_v16 }
 0x597   :  { %1930 = vrot.lane.b32.xlu0 %v6807_v61, %s6221_s4 }
 0x609   :  { %v1931_v62 = vpop.permute.xlu0 %1930 }
 0x60a   :  { %v1932_v63 = vsel %vm33_vm0, %v1931_v62, 0 }
 0x60b   :  { %v2003_v0 = vand.u32 4294901760, %v1932_v63 }
 0x60d   :  { %v2004_v1 = vsub.f32 %v1932_v63, %v2003_v0  ;;  %5718 = vmatmul.mubr.f32.vlgmr.msra.gmra.mxu1 %v2003_v0 }
 0x60e   :  { %5732 = vmatpush3.msra.mxu1 %v6472_v18  ;;  %5739 = vmatprep.mubr.msk.f32.mxu1 %vm6218_vm1, %v6217_v30 }
 0x60f   :  { %v2005_v54 = vand.u32 4294901760, %v2004_v1  ;;  %5733 = vmatprep.subr.mxu1 %v6217_v30 }
 0x610   :  { %5734 = vmatpush3.msra.mxu1 %v6490_v22 }
 0x611   :  { %v2006_v2 = vsub.f32 %v2004_v1, %v2005_v54  ;;  %5735 = vmatprep.subr.mxu1 %v6217_v30 }
 0x612   :  { %5736 = vmatpush3.msra.mxu1 %v6515_v36 }
 0x613   :  { %v2007_v7 = vand.u32 4294901760, %v2006_v2  ;;  %5737 = vmatprep.subr.mxu1 %v6217_v30 }
 0x614   :  { %5738 = vmatpush3.msra.mxu1 %v6534_v39 }
 0x615   :  { %5740 = vmatmul.mubr.f32.vlgmr.msra.gmra.mxu1 %v2005_v54  ;;  %5753 = vmatprep.subr.mxu1 %v6217_v30 }
 0x616   :  { %5707 = vmatmul.mubr.f32.vlgmr.msra.gmra.mxu0 %v2007_v7  ;;  %5754 = vmatpush3.msra.mxu1 %v6472_v18 }
 0x617   :  { %5721 = vmatpush3.msra.mxu0 %v6488_v23  ;;  %5755 = vmatprep.subr.mxu1 %v6217_v30 }
 0x618   :  { %5722 = vmatprep.subr.mxu0 %v6217_v30  ;;  %5756 = vmatpush3.msra.mxu1 %v6490_v22 }
 0x619   :  { %5723 = vmatpush3.msra.mxu0 %v6509_v25  ;;  %5757 = vmatprep.subr.mxu1 %v6217_v30 }
 0x61a   :  { %5724 = vmatprep.subr.mxu0 %v6217_v30  ;;  %5758 = vmatpush3.msra.mxu1 %v6515_v36 }
 0x61b   :  { %5725 = vmatpush3.msra.mxu0 %v6540_v40  ;;  %5759 = vmatprep.subr.mxu1 %v6217_v30 }
 0x61c   :  { %5726 = vmatprep.subr.mxu0 %v6217_v30  ;;  %5728 = vmatprep.mubr.msk.f32.mxu0 %vm6218_vm1, %v6217_v30 }
 0x61d   :  { %5727 = vmatpush3.msra.mxu0 %v6557_v43  ;;  %5760 = vmatpush3.msra.mxu1 %v6534_v39 }
 0x61e   :  { %5761 = vmatprep.mubr.msk.f32.mxu1 %vm6218_vm1, %v6217_v30  ;;  %5729 = vmatmul.mubr.f32.vlgmr.msra.gmra.mxu0 %v2004_v1 }
 0x61f   :  { %5742 = vmatprep.subr.mxu0 %v6217_v30  ;;  %5762 = vmatmul.mubr.f32.vlgmr.msra.gmra.mxu1 %v2003_v0 }
 0x620   :  { %5743 = vmatpush3.msra.mxu0 %v6506_v3  ;;  %5750 = vmatprep.mubr.msk.f32.mxu0 %vm6218_vm1, %v6217_v30 }
 0x621   :  { %5744 = vmatprep.subr.mxu0 %v6217_v30  ;;  %5775 = vmatprep.subr.mxu1 %v6217_v30 }
 0x622   :  { %5745 = vmatpush3.msra.mxu0 %v6532_v38  ;;  %5776 = vmatpush3.msra.mxu1 %v6552_v5 }
 0x623   :  { %5746 = vmatprep.subr.mxu0 %v6217_v30  ;;  %5777 = vmatprep.subr.mxu1 %v6217_v30 }
 0x624   :  { %5747 = vmatpush3.msra.mxu0 %v6562_v44  ;;  %5778 = vmatpush3.msra.mxu1 %v6571_v15 }
 0x625   :  { %5748 = vmatprep.subr.mxu0 %v6217_v30  ;;  %5779 = vmatprep.subr.mxu1 %v6217_v30 }
 0x626   :  { %5749 = vmatpush3.msra.mxu0 %v6574_v45  ;;  %5780 = vmatpush3.msra.mxu1 %v6591_v47 }
 0x627   :  { %5751 = vmatmul.mubr.f32.vlgmr.msra.gmra.mxu0 %v2003_v0  ;;  %5781 = vmatprep.subr.mxu1 %v6217_v30 }
 0x628   :  { %5782 = vmatpush3.msra.mxu1 %v6600_v48  ;;  %5764 = vmatprep.subr.mxu0 %v6217_v30 }
 0x629   :  { %5783 = vmatprep.mubr.msk.f32.mxu1 %vm6218_vm1, %v6217_v30  ;;  %5797 = vmatprep.subr.mxu1 %v6217_v30 }
 0x62a   :  { %5765 = vmatpush3.msra.mxu0 %v6472_v18  ;;  %5772 = vmatprep.mubr.msk.f32.mxu0 %vm6218_vm1, %v6217_v30 }
 0x62b   :  { %5766 = vmatprep.subr.mxu0 %v6217_v30 }
 0x62c   :  { %5767 = vmatpush3.msra.mxu0 %v6490_v22 }
 0x62d   :  { %5768 = vmatprep.subr.mxu0 %v6217_v30 }
 0x62e   :  { %5769 = vmatpush3.msra.mxu0 %v6515_v36 }
 0x62f   :  { %5770 = vmatprep.subr.mxu0 %v6217_v30 }
 0x630   :  { %5771 = vmatpush3.msra.mxu0 %v6534_v39 }
 0x631   :  { %5786 = vmatprep.subr.mxu0 %v6217_v30 }
 0x6cd   :  { %v2100_v8 = vpop.f32.mrf.mxu1 }
 0x6cf   :  { %v5719_v10 = vpop.f32.mrf.mxu1 }
 0x6d5   :  { %v2257_v11 = vpop.f32.mrf.mxu1 }
 0x6d6   :  { %v2009_v12 = vpop.f32.mrf.mxu0 }
 0x6d7   :  { %v5741_v14 = vpop.f32.mrf.mxu1  ;;  %v2101_v34 = vadd.f32 %v2100_v8, %v2009_v12 }
 0x6d8   :  { %v5708_v20 = vpop.f32.mrf.mxu0 }
 0x6de   :  { %v2180_v26 = vpop.f32.mrf.mxu0 }
 0x6df   :  { %v2415_v31 = vpop.f32.mrf.mxu1  ;;  %v2181_v24 = vadd.f32 %v2180_v26, %v2101_v34 }
 0x6e0   :  { %v5730_v21 = vpop.f32.mrf.mxu0 }
 0x6e1   :  { %v5763_v32 = vpop.f32.mrf.mxu1  ;;  %v2258_v50 = vadd.f32 %v2257_v11, %v2181_v24 }
 0x6e7   :  { %v2340_v53 = vpop.f32.mrf.mxu0 }
 0x6e8   :  { %v2341_v60 = vadd.f32 %v2340_v53, %v2258_v50 }
 0x6e9   :  { %v5752_v37 = vpop.f32.mrf.mxu0 }
 0x6ea   :  { %v2416_v17 = vadd.f32 %v2415_v31, %v2341_v60 }
 0x6ec   :  { %v2419_v41 = vadd.f32 %v2416_v17, %v6703_v33 }
 0x6ee   :  { %v5128_v19 = vmul.f32 -1.442695, %v2419_v41 }
 0x6f0   :  { %6117 = vpow2.f32 %v5128_v19 }
 0x6fd   :  { %v6118_v27 = vpop.eup %6117 }
 0x6fe   :  { %v2423_v9 = vadd.f32 1.0, %v6118_v27 }
 0x700   :  { %6119 = vrcp.f32 %v2423_v9 }
 0x70d   :  { %v6120_v46 = vpop.eup %6119 }
 0x70e   :  { %v2426_v16 = vmul.f32 %v6120_v46, %v6718_v4 }
 0x710   :  { %v2427_v29 = vadd.f32 %v2426_v16, %v6721_v6 }
 0x712   :  { %2430 = vrot.lane.b32.xlu1 %v2427_v29, %s6220_s2  ;;  %v2428_v56 = vmul.f32 %v2427_v29, %v6803_v13 }
 0x784   :  { %v2431_v49 = vpop.permute.xlu1 %2430 }
 0x785   :  { %v2433_v52 = vmul.f32 %v2431_v49, %v2427_v29 }
 0x787   :  { %2435 = vrot.lane.b32.xlu0 %v2433_v52, %s6221_s4 }
 0x7f9   :  { %v2436_v57 = vpop.permute.xlu0 %2435 }
 0x7fa   :  { %v6878_v33 = vadd.f32 %v2436_v57, %v2428_v56 }
 0x7fc   :  { %6121 = vtanh.f32 %v6878_v33 }
 0x809   :  { %v6122_v58 = vpop.eup %6121 }
 0x80a   :  { %2441 = vrot.lane.b32.xlu1 %v6122_v58, %s6220_s2 }
 0x87c   :  { %v2442_v62 = vpop.permute.xlu1 %2441 }
 0x87d   :  { %v6882_v63 = vmul.f32 %v2442_v62, %v2427_v29 }
 0x87f   :  { %2449 = vrot.lane.b32.xlu0 %v6882_v63, %s6221_s4 }
 0x8f1   :  { %v2450_v0 = vpop.permute.xlu0 %2449 }
 0x8f2   :  { %v2451_v1 = vsel %vm33_vm0, %v2450_v0, 0 }
 0x8f3   :  { %v2522_v54 = vand.u32 4294901760, %v2451_v1 }
 0x8f5   :  { %v2523_v2 = vsub.f32 %v2451_v1, %v2522_v54  ;;  %5784 = vmatmul.mubr.f32.vlgmr.msra.gmra.mxu1 %v2522_v54 }
 0x8f6   :  { %5798 = vmatpush3.msra.mxu1 %v6472_v18  ;;  %5805 = vmatprep.mubr.msk.f32.mxu1 %vm6218_vm1, %v6217_v30 }
 0x8f7   :  { %v2524_v13 = vand.u32 4294901760, %v2523_v2  ;;  %5799 = vmatprep.subr.mxu1 %v6217_v30 }
 0x8f8   :  { %5800 = vmatpush3.msra.mxu1 %v6490_v22 }
 0x8f9   :  { %v2525_v7 = vsub.f32 %v2523_v2, %v2524_v13  ;;  %5801 = vmatprep.subr.mxu1 %v6217_v30 }
 0x8fa   :  { %5802 = vmatpush3.msra.mxu1 %v6515_v36 }
 0x8fb   :  { %v2526_v8 = vand.u32 4294901760, %v2525_v7  ;;  %5803 = vmatprep.subr.mxu1 %v6217_v30 }
 0x8fc   :  { %5804 = vmatpush3.msra.mxu1 %v6534_v39 }
 0x8fd   :  { %5806 = vmatmul.mubr.f32.vlgmr.msra.gmra.mxu1 %v2524_v13  ;;  %5819 = vmatprep.subr.mxu1 %v6217_v30 }
 0x8fe   :  { %5773 = vmatmul.mubr.f32.vlgmr.msra.gmra.mxu0 %v2526_v8  ;;  %5820 = vmatpush3.msra.mxu1 %v6472_v18 }
 0x8ff   :  { %5787 = vmatpush3.msra.mxu0 %v6488_v23  ;;  %5821 = vmatprep.subr.mxu1 %v6217_v30 }
 0x900   :  { %5788 = vmatprep.subr.mxu0 %v6217_v30  ;;  %5822 = vmatpush3.msra.mxu1 %v6490_v22 }
 0x901   :  { %5789 = vmatpush3.msra.mxu0 %v6509_v25  ;;  %5823 = vmatprep.subr.mxu1 %v6217_v30 }
 0x902   :  { %5790 = vmatprep.subr.mxu0 %v6217_v30  ;;  %5824 = vmatpush3.msra.mxu1 %v6515_v36 }
 0x903   :  { %5791 = vmatpush3.msra.mxu0 %v6540_v40  ;;  %5825 = vmatprep.subr.mxu1 %v6217_v30 }
 0x904   :  { %5792 = vmatprep.subr.mxu0 %v6217_v30  ;;  %5794 = vmatprep.mubr.msk.f32.mxu0 %vm6218_vm1, %v6217_v30 }
 0x905   :  { %5793 = vmatpush3.msra.mxu0 %v6557_v43  ;;  %5826 = vmatpush3.msra.mxu1 %v6534_v39 }
 0x906   :  { %5827 = vmatprep.mubr.msk.f32.mxu1 %vm6218_vm1, %v6217_v30  ;;  %5795 = vmatmul.mubr.f32.vlgmr.msra.gmra.mxu0 %v2523_v2 }
 0x907   :  { %5808 = vmatprep.subr.mxu0 %v6217_v30  ;;  %5828 = vmatmul.mubr.f32.vlgmr.msra.gmra.mxu1 %v2522_v54 }
 0x908   :  { %5809 = vmatpush3.msra.mxu0 %v6506_v3  ;;  %5816 = vmatprep.mubr.msk.f32.mxu0 %vm6218_vm1, %v6217_v30 }
 0x909   :  { %5810 = vmatprep.subr.mxu0 %v6217_v30  ;;  %5841 = vmatprep.subr.mxu1 %v6217_v30 }
 0x90a   :  { %5811 = vmatpush3.msra.mxu0 %v6532_v38  ;;  %5842 = vmatpush3.msra.mxu1 %v6552_v5 }
 0x90b   :  { %5812 = vmatprep.subr.mxu0 %v6217_v30  ;;  %5843 = vmatprep.subr.mxu1 %v6217_v30 }
 0x90c   :  { %5813 = vmatpush3.msra.mxu0 %v6562_v44  ;;  %5844 = vmatpush3.msra.mxu1 %v6571_v15 }
 0x90d   :  { %5814 = vmatprep.subr.mxu0 %v6217_v30  ;;  %5845 = vmatprep.subr.mxu1 %v6217_v30 }
 0x90e   :  { %5815 = vmatpush3.msra.mxu0 %v6574_v45  ;;  %5846 = vmatpush3.msra.mxu1 %v6591_v47 }
 0x90f   :  { %5817 = vmatmul.mubr.f32.vlgmr.msra.gmra.mxu0 %v2522_v54  ;;  %5847 = vmatprep.subr.mxu1 %v6217_v30 }
 0x910   :  { %5848 = vmatpush3.msra.mxu1 %v6600_v48  ;;  %5830 = vmatprep.subr.mxu0 %v6217_v30 }
 0x911   :  { %5849 = vmatprep.mubr.msk.f32.mxu1 %vm6218_vm1, %v6217_v30  ;;  %5863 = vmatprep.subr.mxu1 %v6217_v30 }
 0x912   :  { %5831 = vmatpush3.msra.mxu0 %v6472_v18  ;;  %5838 = vmatprep.mubr.msk.f32.mxu0 %vm6218_vm1, %v6217_v30 }
 0x913   :  { %5832 = vmatprep.subr.mxu0 %v6217_v30 }
 0x914   :  { %5833 = vmatpush3.msra.mxu0 %v6490_v22 }
 0x915   :  { %5834 = vmatprep.subr.mxu0 %v6217_v30 }
 0x916   :  { %5835 = vmatpush3.msra.mxu0 %v6515_v36 }
 0x917   :  { %5836 = vmatprep.subr.mxu0 %v6217_v30 }
 0x918   :  { %5837 = vmatpush3.msra.mxu0 %v6534_v39 }
 0x919   :  { %5852 = vmatprep.subr.mxu0 %v6217_v30 }
 0x9b5   :  { %v2619_v10 = vpop.f32.mrf.mxu1 }
 0x9b7   :  { %v5785_v11 = vpop.f32.mrf.mxu1 }
 0x9bd   :  { %v2776_v12 = vpop.f32.mrf.mxu1 }
 0x9be   :  { %v2528_v14 = vpop.f32.mrf.mxu0 }
 0x9bf   :  { %v5807_v20 = vpop.f32.mrf.mxu1  ;;  %v2620_v21 = vadd.f32 %v2619_v10, %v2528_v14 }
 0x9c0   :  { %v5774_v26 = vpop.f32.mrf.mxu0 }
 0x9c6   :  { %v2699_v31 = vpop.f32.mrf.mxu0 }
 0x9c7   :  { %v2934_v34 = vpop.f32.mrf.mxu1  ;;  %v2700_v50 = vadd.f32 %v2699_v31, %v2620_v21 }
 0x9c8   :  { %v5796_v32 = vpop.f32.mrf.mxu0 }
 0x9c9   :  { %v5829_v24 = vpop.f32.mrf.mxu1  ;;  %v2777_v53 = vadd.f32 %v2776_v12, %v2700_v50 }
 0x9cf   :  { %v2859_v60 = vpop.f32.mrf.mxu0 }
 0x9d0   :  { %v2860_v37 = vadd.f32 %v2859_v60, %v2777_v53 }
 0x9d1   :  { %v5818_v17 = vpop.f32.mrf.mxu0 }
 0x9d2   :  { %v2935_v41 = vadd.f32 %v2934_v34, %v2860_v37 }
 0x9d4   :  { %v2938_v19 = vadd.f32 %v2935_v41, %v6701_v35 }
 0x9d6   :  { %v5129_v27 = vmul.f32 -1.442695, %v2938_v19 }
 0x9d8   :  { %6123 = vpow2.f32 %v5129_v27 }
 0x9e5   :  { %v6124_v9 = vpop.eup %6123 }
 0x9e6   :  { %v2942_v46 = vadd.f32 1.0, %v6124_v9 }
 0x9e8   :  { %6125 = vrcp.f32 %v2942_v46 }
 0x9f5   :  { %v6126_v16 = vpop.eup %6125 }
 0x9f6   :  { %v2945_v29 = vmul.f32 %v6126_v16, %v6718_v4 }
 0x9f8   :  { %v2946_v49 = vadd.f32 %v2945_v29, %v6721_v6 }
 0x9fa   :  { %2949 = vrot.lane.b32.xlu1 %v2946_v49, %s6220_s2  ;;  %v2947_v57 = vmul.f32 %v2946_v49, %v6878_v33 }
 0xa6c   :  { %v2950_v52 = vpop.permute.xlu1 %2949 }
 0xa6d   :  { %v2952_v56 = vmul.f32 %v2950_v52, %v2946_v49 }
 0xa6f   :  { %2954 = vrot.lane.b32.xlu0 %v2952_v56, %s6221_s4 }
 0xae1   :  { %v2955_v58 = vpop.permute.xlu0 %2954 }
 0xae2   :  { %v6953_v35 = vadd.f32 %v2955_v58, %v2947_v57 }
 0xae4   :  { %6127 = vtanh.f32 %v6953_v35 }
 0xaf1   :  { %v6128_v62 = vpop.eup %6127 }
 0xaf2   :  { %2960 = vrot.lane.b32.xlu1 %v6128_v62, %s6220_s2 }
 0xb64   :  { %v2961_v0 = vpop.permute.xlu1 %2960 }
 0xb65   :  { %v6957_v1 = vmul.f32 %v2961_v0, %v2946_v49 }
 0xb67   :  { %2980 = vrot.lane.b32.xlu0 %v6957_v1, %s6221_s4 }
 0xbd9   :  { %v2981_v54 = vpop.permute.xlu0 %2980 }
 0xbda   :  { %v2982_v2 = vsel %vm33_vm0, %v2981_v54, 0 }
 0xbdb   :  { %v3053_v13 = vand.u32 4294901760, %v2982_v2 }
 0xbdd   :  { %v3054_v7 = vsub.f32 %v2982_v2, %v3053_v13  ;;  %5850 = vmatmul.mubr.f32.vlgmr.msra.gmra.mxu1 %v3053_v13 }
 0xbde   :  { %5864 = vmatpush3.msra.mxu1 %v6472_v18  ;;  %5871 = vmatprep.mubr.msk.f32.mxu1 %vm6218_vm1, %v6217_v30 }
 0xbdf   :  { %v3055_v33 = vand.u32 4294901760, %v3054_v7  ;;  %5865 = vmatprep.subr.mxu1 %v6217_v30 }
 0xbe0   :  { %5866 = vmatpush3.msra.mxu1 %v6490_v22 }
 0xbe1   :  { %v3056_v8 = vsub.f32 %v3054_v7, %v3055_v33  ;;  %5867 = vmatprep.subr.mxu1 %v6217_v30 }
 0xbe2   :  { %5868 = vmatpush3.msra.mxu1 %v6515_v36 }
 0xbe3   :  { %v3057_v10 = vand.u32 4294901760, %v3056_v8  ;;  %5869 = vmatprep.subr.mxu1 %v6217_v30 }
 0xbe4   :  { %5870 = vmatpush3.msra.mxu1 %v6534_v39 }
 0xbe5   :  { %5872 = vmatmul.mubr.f32.vlgmr.msra.gmra.mxu1 %v3055_v33  ;;  %5885 = vmatprep.subr.mxu1 %v6217_v30 }
 0xbe6   :  { %5839 = vmatmul.mubr.f32.vlgmr.msra.gmra.mxu0 %v3057_v10  ;;  %5886 = vmatpush3.msra.mxu1 %v6472_v18 }
 0xbe7   :  { %5853 = vmatpush3.msra.mxu0 %v6488_v23  ;;  %5887 = vmatprep.subr.mxu1 %v6217_v30 }
 0xbe8   :  { %5854 = vmatprep.subr.mxu0 %v6217_v30  ;;  %5888 = vmatpush3.msra.mxu1 %v6490_v22 }
 0xbe9   :  { %5855 = vmatpush3.msra.mxu0 %v6509_v25  ;;  %5889 = vmatprep.subr.mxu1 %v6217_v30 }
 0xbea   :  { %5856 = vmatprep.subr.mxu0 %v6217_v30  ;;  %5890 = vmatpush3.msra.mxu1 %v6515_v36 }
 0xbeb   :  { %5857 = vmatpush3.msra.mxu0 %v6540_v40  ;;  %5891 = vmatprep.subr.mxu1 %v6217_v30 }
 0xbec   :  { %5858 = vmatprep.subr.mxu0 %v6217_v30  ;;  %5860 = vmatprep.mubr.msk.f32.mxu0 %vm6218_vm1, %v6217_v30 }
 0xbed   :  { %5859 = vmatpush3.msra.mxu0 %v6557_v43  ;;  %5892 = vmatpush3.msra.mxu1 %v6534_v39 }
 0xbee   :  { %5893 = vmatprep.mubr.msk.f32.mxu1 %vm6218_vm1, %v6217_v30  ;;  %5861 = vmatmul.mubr.f32.vlgmr.msra.gmra.mxu0 %v3054_v7 }
 0xbef   :  { %5874 = vmatprep.subr.mxu0 %v6217_v30  ;;  %5894 = vmatmul.mubr.f32.vlgmr.msra.gmra.mxu1 %v3053_v13 }
 0xbf0   :  { %5875 = vmatpush3.msra.mxu0 %v6506_v3  ;;  %5882 = vmatprep.mubr.msk.f32.mxu0 %vm6218_vm1, %v6217_v30 }
 0xbf1   :  { %5876 = vmatprep.subr.mxu0 %v6217_v30  ;;  %5907 = vmatprep.subr.mxu1 %v6217_v30 }
 0xbf2   :  { %5877 = vmatpush3.msra.mxu0 %v6532_v38  ;;  %5908 = vmatpush3.msra.mxu1 %v6552_v5 }
 0xbf3   :  { %5878 = vmatprep.subr.mxu0 %v6217_v30  ;;  %5909 = vmatprep.subr.mxu1 %v6217_v30 }
 0xbf4   :  { %5879 = vmatpush3.msra.mxu0 %v6562_v44  ;;  %5910 = vmatpush3.msra.mxu1 %v6571_v15 }
 0xbf5   :  { %5880 = vmatprep.subr.mxu0 %v6217_v30  ;;  %5911 = vmatprep.subr.mxu1 %v6217_v30 }
 0xbf6   :  { %5881 = vmatpush3.msra.mxu0 %v6574_v45  ;;  %5912 = vmatpush3.msra.mxu1 %v6591_v47 }
 0xbf7   :  { %5883 = vmatmul.mubr.f32.vlgmr.msra.gmra.mxu0 %v3053_v13  ;;  %5913 = vmatprep.subr.mxu1 %v6217_v30 }
 0xbf8   :  { %5914 = vmatpush3.msra.mxu1 %v6600_v48  ;;  %5896 = vmatprep.subr.mxu0 %v6217_v30 }
 0xbf9   :  { %5915 = vmatprep.mubr.msk.f32.mxu1 %vm6218_vm1, %v6217_v30  ;;  %5929 = vmatprep.subr.mxu1 %v6217_v30 }
 0xbfa   :  { %5897 = vmatpush3.msra.mxu0 %v6472_v18  ;;  %5904 = vmatprep.mubr.msk.f32.mxu0 %vm6218_vm1, %v6217_v30 }
 0xbfb   :  { %5898 = vmatprep.subr.mxu0 %v6217_v30 }
 0xbfc   :  { %5899 = vmatpush3.msra.mxu0 %v6490_v22 }
 0xbfd   :  { %5900 = vmatprep.subr.mxu0 %v6217_v30 }
 0xbfe   :  { %5901 = vmatpush3.msra.mxu0 %v6515_v36 }
 0xbff   :  { %5902 = vmatprep.subr.mxu0 %v6217_v30 }
 0xc00   :  { %5903 = vmatpush3.msra.mxu0 %v6534_v39 }
 0xc01   :  { %5918 = vmatprep.subr.mxu0 %v6217_v30 }
 0xc9d   :  { %v3150_v11 = vpop.f32.mrf.mxu1 }
 0xc9f   :  { %v5851_v12 = vpop.f32.mrf.mxu1 }
 0xca5   :  { %v3307_v14 = vpop.f32.mrf.mxu1 }
 0xca6   :  { %v3059_v20 = vpop.f32.mrf.mxu0 }
 0xca7   :  { %v5873_v26 = vpop.f32.mrf.mxu1  ;;  %v3151_v32 = vadd.f32 %v3150_v11, %v3059_v20 }
 0xca8   :  { %v5840_v31 = vpop.f32.mrf.mxu0 }
 0xcae   :  { %v3230_v34 = vpop.f32.mrf.mxu0 }
 0xcaf   :  { %v3465_v21 = vpop.f32.mrf.mxu1  ;;  %v3231_v53 = vadd.f32 %v3230_v34, %v3151_v32 }
 0xcb0   :  { %v5862_v24 = vpop.f32.mrf.mxu0 }
 0xcb1   :  { %v5895_v50 = vpop.f32.mrf.mxu1  ;;  %v3308_v60 = vadd.f32 %v3307_v14, %v3231_v53 }
 0xcb7   :  { %v3390_v37 = vpop.f32.mrf.mxu0 }
 0xcb8   :  { %v3391_v17 = vadd.f32 %v3390_v37, %v3308_v60 }
 0xcb9   :  { %v5884_v41 = vpop.f32.mrf.mxu0 }
 0xcba   :  { %v3466_v19 = vadd.f32 %v3465_v21, %v3391_v17 }
 0xcbc   :  { %v3469_v27 = vadd.f32 %v3466_v19, %v6707_v28 }
 0xcbe   :  { %v5130_v9 = vmul.f32 -1.442695, %v3469_v27 }
 0xcc0   :  { %6129 = vpow2.f32 %v5130_v9 }
 0xccd   :  { %v6130_v46 = vpop.eup %6129 }
 0xcce   :  { %v3473_v16 = vadd.f32 1.0, %v6130_v46 }
 0xcd0   :  { %6131 = vrcp.f32 %v3473_v16 }
 0xcdd   :  { %v6132_v29 = vpop.eup %6131 }
 0xcde   :  { %v3476_v49 = vmul.f32 %v6132_v29, %v6718_v4 }
 0xce0   :  { %v3477_v52 = vadd.f32 %v3476_v49, %v6721_v6 }
 0xce2   :  { %3480 = vrot.lane.b32.xlu1 %v3477_v52, %s6220_s2  ;;  %v3478_v58 = vmul.f32 %v3477_v52, %v6953_v35 }
 0xd54   :  { %v3481_v56 = vpop.permute.xlu1 %3480 }
 0xd55   :  { %v3483_v57 = vmul.f32 %v3481_v56, %v3477_v52 }
 0xd57   :  { %3485 = vrot.lane.b32.xlu0 %v3483_v57, %s6221_s4 }
 0xdc9   :  { %v3486_v62 = vpop.permute.xlu0 %3485 }
 0xdca   :  { %v7028_v28 = vadd.f32 %v3486_v62, %v3478_v58 }
 0xdcc   :  { %6133 = vtanh.f32 %v7028_v28 }
 0xdd9   :  { %v6134_v0 = vpop.eup %6133 }
 0xdda   :  { %3491 = vrot.lane.b32.xlu1 %v6134_v0, %s6220_s2 }
 0xe4c   :  { %v3492_v54 = vpop.permute.xlu1 %3491 }
 0xe4d   :  { %v3494_v2 = vmul.f32 %v3492_v54, %v3477_v52 }
 0xe4f   :  { %3499 = vrot.lane.b32.xlu0 %v3494_v2, %s6221_s4 }
 0xec1   :  { %v7033_v13 = vpop.permute.xlu0 %3499 }
 0xec2   :  { %v3501_v7 = vsel %vm33_vm0, %v7033_v13, 0 }
 0xec3   :  { %v3572_v33 = vand.u32 4294901760, %v3501_v7 }
 0xec5   :  { %v3573_v8 = vsub.f32 %v3501_v7, %v3572_v33  ;;  %5916 = vmatmul.mubr.f32.vlgmr.msra.gmra.mxu1 %v3572_v33 }
 0xec6   :  { %5930 = vmatpush3.msra.mxu1 %v6472_v18  ;;  %5937 = vmatprep.mubr.msk.f32.mxu1 %vm6218_vm1, %v6217_v30 }
 0xec7   :  { %v3574_v35 = vand.u32 4294901760, %v3573_v8  ;;  %5931 = vmatprep.subr.mxu1 %v6217_v30 }
 0xec8   :  { %5932 = vmatpush3.msra.mxu1 %v6490_v22 }
 0xec9   :  { %v3575_v10 = vsub.f32 %v3573_v8, %v3574_v35  ;;  %5933 = vmatprep.subr.mxu1 %v6217_v30 }
 0xeca   :  { %5934 = vmatpush3.msra.mxu1 %v6515_v36 }
 0xecb   :  { %5935 = vmatprep.subr.mxu1 %v6217_v30  ;;  %v3576_v11 = vand.u32 4294901760, %v3575_v10 }
 0xecc   :  { %5936 = vmatpush3.msra.mxu1 %v6534_v39 }
 0xecd   :  { %5938 = vmatmul.mubr.f32.vlgmr.msra.gmra.mxu1 %v3574_v35  ;;  %5951 = vmatprep.subr.mxu1 %v6217_v30 }
 0xece   :  { %5905 = vmatmul.mubr.f32.vlgmr.msra.gmra.mxu0 %v3576_v11  ;;  %5952 = vmatpush3.msra.mxu1 %v6472_v18 }
 0xecf   :  { %5919 = vmatpush3.msra.mxu0 %v6488_v23  ;;  %5953 = vmatprep.subr.mxu1 %v6217_v30 }
 0xed0   :  { %5920 = vmatprep.subr.mxu0 %v6217_v30  ;;  %5954 = vmatpush3.msra.mxu1 %v6490_v22 }
 0xed1   :  { %5921 = vmatpush3.msra.mxu0 %v6509_v25  ;;  %5955 = vmatprep.subr.mxu1 %v6217_v30 }
 0xed2   :  { %5922 = vmatprep.subr.mxu0 %v6217_v30  ;;  %5956 = vmatpush3.msra.mxu1 %v6515_v36 }
 0xed3   :  { %5923 = vmatpush3.msra.mxu0 %v6540_v40  ;;  %5957 = vmatprep.subr.mxu1 %v6217_v30 }
 0xed4   :  { %5924 = vmatprep.subr.mxu0 %v6217_v30  ;;  %5926 = vmatprep.mubr.msk.f32.mxu0 %vm6218_vm1, %v6217_v30 }
 0xed5   :  { %5925 = vmatpush3.msra.mxu0 %v6557_v43  ;;  %5958 = vmatpush3.msra.mxu1 %v6534_v39 }
 0xed6   :  { %5959 = vmatprep.mubr.msk.f32.mxu1 %vm6218_vm1, %v6217_v30  ;;  %5927 = vmatmul.mubr.f32.vlgmr.msra.gmra.mxu0 %v3573_v8 }
 0xed7   :  { %5940 = vmatprep.subr.mxu0 %v6217_v30  ;;  %5960 = vmatmul.mubr.f32.vlgmr.msra.gmra.mxu1 %v3572_v33 }
 0xed8   :  { %5941 = vmatpush3.msra.mxu0 %v6506_v3  ;;  %5948 = vmatprep.mubr.msk.f32.mxu0 %vm6218_vm1, %v6217_v30 }
 0xed9   :  { %5942 = vmatprep.subr.mxu0 %v6217_v30  ;;  %5973 = vmatprep.subr.mxu1 %v6217_v30 }
 0xeda   :  { %5943 = vmatpush3.msra.mxu0 %v6532_v38  ;;  %5974 = vmatpush3.msra.mxu1 %v6552_v5 }
 0xedb   :  { %5944 = vmatprep.subr.mxu0 %v6217_v30  ;;  %5975 = vmatprep.subr.mxu1 %v6217_v30 }
 0xedc   :  { %5945 = vmatpush3.msra.mxu0 %v6562_v44  ;;  %5976 = vmatpush3.msra.mxu1 %v6571_v15 }
 0xedd   :  { %5946 = vmatprep.subr.mxu0 %v6217_v30  ;;  %5977 = vmatprep.subr.mxu1 %v6217_v30 }
 0xede   :  { %5947 = vmatpush3.msra.mxu0 %v6574_v45  ;;  %5978 = vmatpush3.msra.mxu1 %v6591_v47 }
 0xedf   :  { %5949 = vmatmul.mubr.f32.vlgmr.msra.gmra.mxu0 %v3572_v33  ;;  %5979 = vmatprep.subr.mxu1 %v6217_v30 }
 0xee0   :  { %5980 = vmatpush3.msra.mxu1 %v6600_v48  ;;  %5962 = vmatprep.subr.mxu0 %v6217_v30 }
 0xee1   :  { %5981 = vmatprep.mubr.msk.f32.mxu1 %vm6218_vm1, %v6217_v30  ;;  %5995 = vmatprep.subr.mxu1 %v6217_v30 }
 0xee2   :  { %5963 = vmatpush3.msra.mxu0 %v6472_v18  ;;  %5970 = vmatprep.mubr.msk.f32.mxu0 %vm6218_vm1, %v6217_v30 }
 0xee3   :  { %5964 = vmatprep.subr.mxu0 %v6217_v30 }
 0xee4   :  { %5965 = vmatpush3.msra.mxu0 %v6490_v22 }
 0xee5   :  { %5966 = vmatprep.subr.mxu0 %v6217_v30 }
 0xee6   :  { %5967 = vmatpush3.msra.mxu0 %v6515_v36 }
 0xee7   :  { %5968 = vmatprep.subr.mxu0 %v6217_v30 }
 0xee8   :  { %5969 = vmatpush3.msra.mxu0 %v6534_v39 }
 0xee9   :  { %5984 = vmatprep.subr.mxu0 %v6217_v30 }
 0xf85   :  { %v3669_v12 = vpop.f32.mrf.mxu1 }
 0xf87   :  { %v5917_v14 = vpop.f32.mrf.mxu1 }
 0xf8d   :  { %v3826_v20 = vpop.f32.mrf.mxu1 }
 0xf8e   :  { %v3578_v26 = vpop.f32.mrf.mxu0 }
 0xf8f   :  { %v5939_v31 = vpop.f32.mrf.mxu1  ;;  %v3670_v24 = vadd.f32 %v3669_v12, %v3578_v26 }
 0xf90   :  { %v5906_v34 = vpop.f32.mrf.mxu0 }
 0xf96   :  { %v3749_v21 = vpop.f32.mrf.mxu0 }
 0xf97   :  { %v3984_v32 = vpop.f32.mrf.mxu1  ;;  %v3750_v60 = vadd.f32 %v3749_v21, %v3670_v24 }
 0xf98   :  { %v5928_v50 = vpop.f32.mrf.mxu0 }
 0xf99   :  { %v5961_v53 = vpop.f32.mrf.mxu1  ;;  %v3827_v37 = vadd.f32 %v3826_v20, %v3750_v60 }
 0xf9f   :  { %v3909_v17 = vpop.f32.mrf.mxu0 }
 0xfa0   :  { %v3910_v41 = vadd.f32 %v3909_v17, %v3827_v37 }
 0xfa1   :  { %v5950_v19 = vpop.f32.mrf.mxu0 }
 0xfa2   :  { %v3985_v27 = vadd.f32 %v3984_v32, %v3910_v41 }
 0xfa4   :  { %v3988_v9 = vadd.f32 %v3985_v27, %v6705_v42 }
 0xfa6   :  { %v5131_v46 = vmul.f32 -1.442695, %v3988_v9 }
 0xfa8   :  { %6135 = vpow2.f32 %v5131_v46 }
 0xfb5   :  { %v6136_v16 = vpop.eup %6135 }
 0xfb6   :  { %v3992_v29 = vadd.f32 1.0, %v6136_v16 }
 0xfb8   :  { %6137 = vrcp.f32 %v3992_v29 }
 0xfc5   :  { %v6138_v49 = vpop.eup %6137 }
 0xfc6   :  { %v3995_v52 = vmul.f32 %v6138_v49, %v6718_v4 }
 0xfc8   :  { %v3996_v56 = vadd.f32 %v3995_v52, %v6721_v6 }
 0xfca   :  { %3999 = vrot.lane.b32.xlu1 %v3996_v56, %s6220_s2  ;;  %v3997_v62 = vmul.f32 %v3996_v56, %v7028_v28 }
0x103c   :  { %v4000_v57 = vpop.permute.xlu1 %3999 }
0x103d   :  { %v4002_v58 = vmul.f32 %v4000_v57, %v3996_v56 }
0x103f   :  { %4004 = vrot.lane.b32.xlu0 %v4002_v58, %s6221_s4 }
0x10b1   :  { %v4005_v0 = vpop.permute.xlu0 %4004 }
0x10b2   :  { %v7103_v42 = vadd.f32 %v4005_v0, %v3997_v62 }
0x10b4   :  { %6139 = vtanh.f32 %v7103_v42 }
0x10c1   :  { %v6140_v54 = vpop.eup %6139 }
0x10c2   :  { %4010 = vrot.lane.b32.xlu1 %v6140_v54, %s6220_s2 }
0x1134   :  { %v4011_v2 = vpop.permute.xlu1 %4010 }
0x1135   :  { %v7107_v7 = vmul.f32 %v4011_v2, %v3996_v56 }
0x1137   :  { %4018 = vrot.lane.b32.xlu0 %v7107_v7, %s6221_s4 }
0x11a9   :  { %v4019_v33 = vpop.permute.xlu0 %4018 }
0x11aa   :  { %v4020_v8 = vsel %vm33_vm0, %v4019_v33, 0 }
0x11ab   :  { %v4091_v35 = vand.u32 4294901760, %v4020_v8 }
0x11ad   :  { %v4092_v10 = vsub.f32 %v4020_v8, %v4091_v35  ;;  %5982 = vmatmul.mubr.f32.vlgmr.msra.gmra.mxu1 %v4091_v35 }
0x11ae   :  { %5996 = vmatpush3.msra.mxu1 %v6472_v18  ;;  %6003 = vmatprep.mubr.msk.f32.mxu1 %vm6218_vm1, %v6217_v30 }
0x11af   :  { %v4093_v28 = vand.u32 4294901760, %v4092_v10  ;;  %5997 = vmatprep.subr.mxu1 %v6217_v30 }
0x11b0   :  { %5998 = vmatpush3.msra.mxu1 %v6490_v22 }
0x11b1   :  { %v4094_v11 = vsub.f32 %v4092_v10, %v4093_v28  ;;  %5999 = vmatprep.subr.mxu1 %v6217_v30 }
0x11b2   :  { %6000 = vmatpush3.msra.mxu1 %v6515_v36 }
0x11b3   :  { %v4095_v12 = vand.u32 4294901760, %v4094_v11  ;;  %6001 = vmatprep.subr.mxu1 %v6217_v30 }
0x11b4   :  { %6002 = vmatpush3.msra.mxu1 %v6534_v39 }
0x11b5   :  { %6004 = vmatmul.mubr.f32.vlgmr.msra.gmra.mxu1 %v4093_v28  ;;  %6017 = vmatprep.subr.mxu1 %v6217_v30 }
0x11b6   :  { %5971 = vmatmul.mubr.f32.vlgmr.msra.gmra.mxu0 %v4095_v12  ;;  %6018 = vmatpush3.msra.mxu1 %v6472_v18 }
0x11b7   :  { %5985 = vmatpush3.msra.mxu0 %v6488_v23  ;;  %6019 = vmatprep.subr.mxu1 %v6217_v30 }
0x11b8   :  { %5986 = vmatprep.subr.mxu0 %v6217_v30  ;;  %6020 = vmatpush3.msra.mxu1 %v6490_v22 }
0x11b9   :  { %5987 = vmatpush3.msra.mxu0 %v6509_v25  ;;  %6021 = vmatprep.subr.mxu1 %v6217_v30 }
0x11ba   :  { %5988 = vmatprep.subr.mxu0 %v6217_v30  ;;  %6022 = vmatpush3.msra.mxu1 %v6515_v36 }
0x11bb   :  { %5989 = vmatpush3.msra.mxu0 %v6540_v40  ;;  %6023 = vmatprep.subr.mxu1 %v6217_v30 }
0x11bc   :  { %5990 = vmatprep.subr.mxu0 %v6217_v30  ;;  %5992 = vmatprep.mubr.msk.f32.mxu0 %vm6218_vm1, %v6217_v30 }
0x11bd   :  { %5991 = vmatpush3.msra.mxu0 %v6557_v43  ;;  %6024 = vmatpush3.msra.mxu1 %v6534_v39 }
0x11be   :  { %6025 = vmatprep.mubr.msk.f32.mxu1 %vm6218_vm1, %v6217_v30  ;;  %5993 = vmatmul.mubr.f32.vlgmr.msra.gmra.mxu0 %v4092_v10 }
0x11bf   :  { %6006 = vmatprep.subr.mxu0 %v6217_v30  ;;  %6026 = vmatmul.mubr.f32.vlgmr.msra.gmra.mxu1 %v4091_v35 }
0x11c0   :  { %6007 = vmatpush3.msra.mxu0 %v6506_v3  ;;  %6014 = vmatprep.mubr.msk.f32.mxu0 %vm6218_vm1, %v6217_v30 }
0x11c1   :  { %6008 = vmatprep.subr.mxu0 %v6217_v30  ;;  %6039 = vmatprep.subr.mxu1 %v6217_v30 }
0x11c2   :  { %6009 = vmatpush3.msra.mxu0 %v6532_v38  ;;  %6040 = vmatpush3.msra.mxu1 %v6552_v5 }
0x11c3   :  { %6010 = vmatprep.subr.mxu0 %v6217_v30  ;;  %6041 = vmatprep.subr.mxu1 %v6217_v30 }
0x11c4   :  { %6011 = vmatpush3.msra.mxu0 %v6562_v44  ;;  %6042 = vmatpush3.msra.mxu1 %v6571_v15 }
0x11c5   :  { %6012 = vmatprep.subr.mxu0 %v6217_v30  ;;  %6043 = vmatprep.subr.mxu1 %v6217_v30 }
0x11c6   :  { %6013 = vmatpush3.msra.mxu0 %v6574_v45  ;;  %6044 = vmatpush3.msra.mxu1 %v6591_v47 }
0x11c7   :  { %6015 = vmatmul.mubr.f32.vlgmr.msra.gmra.mxu0 %v4091_v35  ;;  %6045 = vmatprep.subr.mxu1 %v6217_v30 }
0x11c8   :  { %6046 = vmatpush3.msra.mxu1 %v6600_v48  ;;  %6028 = vmatprep.subr.mxu0 %v6217_v30 }
0x11c9   :  { %6047 = vmatprep.mubr.msk.f32.mxu1 %vm6218_vm1, %v6217_v30  ;;  %6061 = vmatprep.subr.mxu1 %v6217_v30 }
0x11ca   :  { %6029 = vmatpush3.msra.mxu0 %v6472_v18  ;;  %6036 = vmatprep.mubr.msk.f32.mxu0 %vm6218_vm1, %v6217_v30 }
0x11cb   :  { %6030 = vmatprep.subr.mxu0 %v6217_v30 }
0x11cc   :  { %6031 = vmatpush3.msra.mxu0 %v6490_v22 }
0x11cd   :  { %6032 = vmatprep.subr.mxu0 %v6217_v30 }
0x11ce   :  { %6033 = vmatpush3.msra.mxu0 %v6515_v36 }
0x11cf   :  { %6034 = vmatprep.subr.mxu0 %v6217_v30 }
0x11d0   :  { %6035 = vmatpush3.msra.mxu0 %v6534_v39 }
0x11d1   :  { %6050 = vmatprep.subr.mxu0 %v6217_v30 }
0x126d   :  { %v4188_v5 = vpop.f32.mrf.mxu1 }
0x126f   :  { %v5983_v15 = vpop.f32.mrf.mxu1 }
0x1275   :  { %v4345_v47 = vpop.f32.mrf.mxu1 }
0x1276   :  { %v4097_v48 = vpop.f32.mrf.mxu0 }
0x1277   :  { %v6005_v14 = vpop.f32.mrf.mxu1  ;;  %v4189_v34 = vadd.f32 %v4188_v5, %v4097_v48 }
0x1278   :  { %v5972_v20 = vpop.f32.mrf.mxu0 }
0x127e   :  { %v4268_v26 = vpop.f32.mrf.mxu0 }
0x127f   :  { %v4503_v31 = vpop.f32.mrf.mxu1  ;;  %v4269_v24 = vadd.f32 %v4268_v26, %v4189_v34 }
0x1280   :  { %v5994_v21 = vpop.f32.mrf.mxu0 }
0x1281   :  { %v6027_v32 = vpop.f32.mrf.mxu1  ;;  %v4346_v50 = vadd.f32 %v4345_v47, %v4269_v24 }
0x1287   :  { %v4428_v53 = vpop.f32.mrf.mxu0 }
0x1288   :  { %v4429_v60 = vadd.f32 %v4428_v53, %v4346_v50 }
0x1289   :  { %v6016_v37 = vpop.f32.mrf.mxu0 }
0x128a   :  { %v4504_v17 = vadd.f32 %v4503_v31, %v4429_v60 }
0x128c   :  { %v4507_v41 = vadd.f32 %v4504_v17, %v6711_v55 }
0x128e   :  { %v5132_v19 = vmul.f32 -1.442695, %v4507_v41 }
0x1290   :  { %6141 = vpow2.f32 %v5132_v19 }
0x129d   :  { %v6142_v27 = vpop.eup %6141 }
0x129e   :  { %v4511_v9 = vadd.f32 1.0, %v6142_v27 }
0x12a0   :  { %6143 = vrcp.f32 %v4511_v9 }
0x12ad   :  { %v6144_v46 = vpop.eup %6143 }
0x12ae   :  { %v4514_v16 = vmul.f32 %v6144_v46, %v6718_v4 }
0x12b0   :  { %v4515_v29 = vadd.f32 %v4514_v16, %v6721_v6 }
0x12b2   :  { %4518 = vrot.lane.b32.xlu1 %v4515_v29, %s6220_s2  ;;  %v4516_v56 = vmul.f32 %v4515_v29, %v7103_v42 }
0x1324   :  { %v4519_v49 = vpop.permute.xlu1 %4518 }
0x1325   :  { %v4521_v52 = vmul.f32 %v4519_v49, %v4515_v29 }
0x1327   :  { %4523 = vrot.lane.b32.xlu0 %v4521_v52, %s6221_s4 }
0x1399   :  { %v4524_v57 = vpop.permute.xlu0 %4523 }
0x139a   :  { %v7178_v55 = vadd.f32 %v4524_v57, %v4516_v56 }
0x139c   :  { %6145 = vtanh.f32 %v7178_v55 }
0x13a9   :  { %v6146_v58 = vpop.eup %6145 }
0x13aa   :  { %4529 = vrot.lane.b32.xlu1 %v6146_v58, %s6220_s2 }
0x141c   :  { %v4530_v62 = vpop.permute.xlu1 %4529 }
0x141d   :  { %v7182_v0 = vmul.f32 %v4530_v62, %v4515_v29 }
0x141f   :  { %4537 = vrot.lane.b32.xlu0 %v7182_v0, %s6221_s4 }
0x1491   :  { %v4538_v54 = vpop.permute.xlu0 %4537 }
0x1492   :  { %v4539_v2 = vsel %vm33_vm0, %v4538_v54, 0 }
0x1493   :  { %v4610_v33 = vand.u32 4294901760, %v4539_v2 }
0x1495   :  { %v4611_v8 = vsub.f32 %v4539_v2, %v4610_v33  ;;  %6048 = vmatmul.mubr.f32.vlgmr.msra.gmra.mxu1 %v4610_v33 }
0x1496   :  { %6062 = vmatpush3.msra.mxu1 %v6472_v18  ;;  %6069 = vmatprep.mubr.msk.f32.mxu1 %vm6218_vm1, %v6217_v30 }
0x1497   :  { %v4612_v42 = vand.u32 4294901760, %v4611_v8  ;;  %6063 = vmatprep.subr.mxu1 %v6217_v30 }
0x1498   :  { %6064 = vmatpush3.msra.mxu1 %v6490_v22 }
0x1499   :  { %v4613_v35 = vsub.f32 %v4611_v8, %v4612_v42  ;;  %6065 = vmatprep.subr.mxu1 %v6217_v30 }
0x149a   :  { %6066 = vmatpush3.msra.mxu1 %v6515_v36 }
0x149b   :  { %v4614_v10 = vand.u32 4294901760, %v4613_v35  ;;  %6067 = vmatprep.subr.mxu1 %v6217_v30 }
0x149c   :  { %6068 = vmatpush3.msra.mxu1 %v6534_v39 }
0x149d   :  { %6070 = vmatmul.mubr.f32.vlgmr.msra.gmra.mxu1 %v4612_v42  ;;  %6083 = vmatprep.subr.mxu1 %v6217_v30 }
0x149e   :  { %6037 = vmatmul.mubr.f32.vlgmr.msra.gmra.mxu0 %v4614_v10  ;;  %6084 = vmatpush3.msra.mxu1 %v6472_v18 }
0x149f   :  { %6051 = vmatpush3.msra.mxu0 %v6488_v23  ;;  %6085 = vmatprep.subr.mxu1 %v6217_v30 }
0x14a0   :  { %6052 = vmatprep.subr.mxu0 %v6217_v30  ;;  %6086 = vmatpush3.msra.mxu1 %v6490_v22 }
0x14a1   :  { %6053 = vmatpush3.msra.mxu0 %v6509_v25  ;;  %6087 = vmatprep.subr.mxu1 %v6217_v30 }
0x14a2   :  { %6054 = vmatprep.subr.mxu0 %v6217_v30  ;;  %6088 = vmatpush3.msra.mxu1 %v6515_v36 }
0x14a3   :  { %6055 = vmatpush3.msra.mxu0 %v6540_v40  ;;  %6089 = vmatprep.subr.mxu1 %v6217_v30 }
0x14a4   :  { %6056 = vmatprep.subr.mxu0 %v6217_v30  ;;  %6058 = vmatprep.mubr.msk.f32.mxu0 %vm6218_vm1, %v6217_v30 }
0x14a5   :  { %6057 = vmatpush3.msra.mxu0 %v6557_v43  ;;  %6090 = vmatpush3.msra.mxu1 %v6534_v39 }
0x14a6   :  { %6091 = vmatprep.mubr.msk.f32.mxu1 %vm6218_vm1, %v6217_v30  ;;  %6059 = vmatmul.mubr.f32.vlgmr.msra.gmra.mxu0 %v4611_v8 }
0x14a7   :  { %6072 = vmatprep.subr.mxu0 %v6217_v30  ;;  %6092 = vmatmul.mubr.f32.vlgmr.msra.gmra.mxu1 %v4610_v33 }
0x14a8   :  { %6073 = vmatpush3.msra.mxu0 %v6506_v3  ;;  %6080 = vmatprep.mubr.msk.f32.mxu0 %vm6218_vm1, %v6217_v30 }
0x14a9   :  { %6074 = vmatprep.subr.mxu0 %v6217_v30 }
0x14aa   :  { %6075 = vmatpush3.msra.mxu0 %v6532_v38 }
0x14ab   :  { %6076 = vmatprep.subr.mxu0 %v6217_v30 }
0x14ac   :  { %6077 = vmatpush3.msra.mxu0 %v6562_v44 }
0x14ad   :  { %6078 = vmatprep.subr.mxu0 %v6217_v30 }
0x14ae   :  { %6079 = vmatpush3.msra.mxu0 %v6574_v45 }
0x14af   :  { %6081 = vmatmul.mubr.f32.vlgmr.msra.gmra.mxu0 %v4610_v33 }
0x1555   :  { %v4707_v18 = vpop.f32.mrf.mxu1 }
0x1557   :  { %v6049_v23 = vpop.f32.mrf.mxu1 }
0x155d   :  { %v4864_v22 = vpop.f32.mrf.mxu1 }
0x155e   :  { %v4616_v3 = vpop.f32.mrf.mxu0 }
0x155f   :  { %v6071_v25 = vpop.f32.mrf.mxu1  ;;  %v4708_v43 = vadd.f32 %v4707_v18, %v4616_v3 }
0x1560   :  { %v6038_v36 = vpop.f32.mrf.mxu0 }
0x1566   :  { %v4787_v39 = vpop.f32.mrf.mxu0 }
0x1567   :  { %v5022_v40 = vpop.f32.mrf.mxu1  ;;  %v4788_v11 = vadd.f32 %v4787_v39, %v4708_v43 }
0x1568   :  { %v6060_v28 = vpop.f32.mrf.mxu0 }
0x1569   :  { %v6093_v38 = vpop.f32.mrf.mxu1  ;;  %v4865_v12 = vadd.f32 %v4864_v22, %v4788_v11 }
0x156f   :  { %v4947_v5 = vpop.f32.mrf.mxu0 }
0x1570   :  { %v4948_v44 = vadd.f32 %v4947_v5, %v4865_v12 }
0x1571   :  { %v6082_v15 = vpop.f32.mrf.mxu0 }
0x1572   :  { %v5023_v30 = vadd.f32 %v5022_v40, %v4948_v44 }
0x1574   :  { %v5026_v45 = vadd.f32 %v5023_v30, %v6709_v51 }
0x1576   :  { %v5133_v47 = vmul.f32 -1.442695, %v5026_v45 }
0x1578   :  { %6147 = vpow2.f32 %v5133_v47 }
0x1585   :  { %v6148_v48 = vpop.eup %6147 }
0x1586   :  { %v5030_v14 = vadd.f32 1.0, %v6148_v48 }
0x1588   :  { %6149 = vrcp.f32 %v5030_v14 }
0x1595   :  { %v6150_v20 = vpop.eup %6149 }
0x1596   :  { %v5033_v26 = vmul.f32 %v6150_v20, %v6718_v4 }
0x1598   :  { %v5034_v31 = vadd.f32 %v5033_v26, %v6721_v6 }
0x159a   :  { %5037 = vrot.lane.b32.xlu1 %v5034_v31, %s6220_s2  ;;  %v5035_v51 = vmul.f32 %v5034_v31, %v7178_v55 }
0x160c   :  { %v5038_v34 = vpop.permute.xlu1 %5037 }
0x160d   :  { %v5040_v21 = vmul.f32 %v5038_v34, %v5034_v31 }
0x160f   :  { %5042 = vrot.lane.b32.xlu0 %v5040_v21, %s6221_s4 }
0x1613   :  { %2965 = vrot.lane.b32.xlu0 %v6807_v61, %s6220_s2 }
0x1617   :  { %2968 = vrot.lane.b32.xlu0 %v6882_v63, %s6222_s17 }
0x1681   :  { %v5043_v32 = vpop.permute.xlu0 %5042 }
0x1682   :  { %v5045_v24 = vadd.f32 %v5043_v32, %v5035_v51 }
0x1684   :  { %6151 = vtanh.f32 %v5045_v24 }
0x1685   :  { %v2966_v4 = vpop.permute.xlu0 %2965 }
0x1686   :  { %v2971_v6 = vsel %vm33_vm0, %v6733_v59, %v2966_v4 }
0x1689   :  { %v2969_v50 = vpop.permute.xlu0 %2968 }
0x168a   :  { %v2973_v53 = vsel %vm2972_vm5, %v2971_v6, %v2969_v50 }
0x168b   :  { %v2975_v61 = vsel %vm2974_vm6, %v2973_v53, %v6957_v1 }
0x168c   :  { %2976 = vst [vmem:[#allocation5] sm:$0xff] %v2975_v61 }
0x1691   :  { %v6152_v60 = vpop.eup %6151 }
0x1692   :  { %5048 = vrot.lane.b32.xlu1 %v6152_v60, %s6220_s2 }
0x1696   :  { %5053 = vrot.lane.b32.xlu1 %v7107_v7, %s6220_s2 }
0x169a   :  { %5056 = vrot.lane.b32.xlu1 %v7182_v0, %s6222_s17 }
0x169e   :  { %5070 = vrot.lane.b32.xlu1 %v5045_v24, %s6222_s17 }
0x1704   :  { %v5049_v63 = vpop.permute.xlu1 %5048 }
0x1705   :  { %v5051_v37 = vmul.f32 %v5049_v63, %v5034_v31 }
0x1707   :  { %5065 = vrot.lane.b32.xlu0 %v5051_v37, %s6221_s4 }
0x1708   :  { %v5054_v59 = vpop.permute.xlu1 %5053 }
0x1709   :  { %v5059_v1 = vsel %vm33_vm0, %v7033_v13, %v5054_v59 }
0x170c   :  { %v5057_v17 = vpop.permute.xlu1 %5056 }
0x170d   :  { %v5060_v41 = vsel %vm2972_vm5, %v5059_v1, %v5057_v17 }
0x170e   :  { %v5061_v19 = vsel %vm2974_vm6, %v5060_v41, %v5051_v37 }
0x170f   :  { %5063 = vst [vmem:[#allocation5 + $0x8] sm:$0xff] %v5061_v19 }
0x1710   :  { %v5071_v7 = vpop.permute.xlu1 %5070 }
0x1711   :  { %6164 = shalt.err (!%p6161_p4)
}
0x1712   :  { %s6224_s20 = smov 128   ;;  %s6225_s21 = smov 8   ;;  %5073 = vst.msk [vmem:[#allocation4] sm:$0xff] %vm33_vm0, %v5071_v7  ;;  %5075 = vst.msk [vmem:[#allocation9] sm:$0xff] %vm33_vm0, %v5071_v7 }
0x1713   :  { %5087 = dma.vmem_to_hbm [thread:$0]  %s5082_s19, 256, %s7267_s6, [#allocation6], %s6224_s20, %s6224_s20, %s6225_s21  }
0x1714   :  { %s6226_s23 = smov [#allocation7]   ;;  %s6227_s25 = smov [#allocation9]  }
0x1715   :  { %s5094_s24 = sshll.u32 %s6226_s23, 4  ;;  %s5104_s26 = sshll.u32 %s6227_s25, 4  ;;  %s5095_s24 = int_to_ptr.vmem [resolvable:$true] %s5094_s24  ;;  %s5105_s26 = int_to_ptr.vmem [resolvable:$true] %s5104_s26 }
0x1716   :  { %s6173_s27 = scalar_lea.vmem %s5095_s24, 128  ;;  %p6178_p6 = scmp.lt.s32.totalorder %s5095_s24, %s5095_s24 }
0x1717   :  { %p6174_p5 = scmp.ne.s32.totalorder %s5095_s24, %s6173_s27  ;;  %p6179_p7 = scmp.lt.s32.totalorder %s6173_s27, %s6173_s27 }
0x1719   :  { %p6180_p8 = por %p6179_p7, %p6178_p6 }
0x171b   :  { %p6181_p9 = pnand %p6180_p8, %p6174_p5 }
0x1779   :  { %v5066_v13 = vpop.permute.xlu0 %5065 }
0x177a   :  { %5068 = vst.msk [vmem:[#allocation3] sm:$0xff] %vm33_vm0, %v5066_v13  ;;  %5074 = vst.msk [vmem:[#allocation7] sm:$0xff] %vm33_vm0, %v5066_v13 }
0x177b   :  { %6184 = shalt.err (!%p6181_p9)
}
0x177c   :  { %5097 = dma.vmem_to_hbm [thread:$0]  %s5095_s24, 128, %s7268_s7, [#allocation8]  }
0x177d   :  { %s6193_s0 = scalar_lea.vmem %s5105_s26, 128  ;;  %p6198_p11 = scmp.lt.s32.totalorder %s5105_s26, %s5105_s26 }
0x177e   :  { %p6194_p10 = scmp.ne.s32.totalorder %s5105_s26, %s6193_s0  ;;  %p6199_p12 = scmp.lt.s32.totalorder %s6193_s0, %s6193_s0 }
0x1780   :  { %p6200_p13 = por %p6199_p12, %p6198_p11 }
0x1782   :  { %p6201_p0 = pnand %p6200_p13, %p6194_p10 }
0x1784   :  { %6204 = shalt.err (!%p6201_p0)
}
0x1785   :  { %5107 = dma.vmem_to_hbm [thread:$0]  %s5105_s26, 128, %s7269_s8, [#allocation8]  }
0x1786   :  { %6213 = dma.done.wait [#allocation6], 256  }
0x1787   :  { %6214 = vsyncadd [#allocation6], 4294967040 }
0x1788   :  { %6215 = dma.done.wait [#allocation8], 256  }
0x1789   :  { %6216 = vsyncadd [#allocation8], 4294967040 }
0x178a   :  { %5117 = vsyncpa [#allocation6], 1 }
0x178b   :  { %5118 = vsyncpa [#allocation8], 1 }

</bundles_post_ra>
